<compile_context>
chip_gen: v6e
topology: v6e:2x2x1
jax: 0.10.0
libtpu: 0.0.40
codegen_flags: <defaults>
</compile_context>

<pallas_src>
import math

import jax
import jax.numpy as jnp
from jax.experimental import pallas as pl
from jax.experimental.pallas import tpu as pltpu


# -------------------------------------------------------------------------
# in-kernel helpers (f32 elementwise math, bf16 MXU operands)
# -------------------------------------------------------------------------
def _gelu(x):
    # tanh-approximate GELU (PyTorch's exact erf GELU differs by <1e-3).
    return 0.5 * x * (1.0 + jnp.tanh(0.7978845608028654 * (x + 0.044715 * x * x * x)))


def _ffn(x, w1, b1, w2, b2):
    """mmcv-style FFN with residual: x + (GELU(x@w1 + b1))@w2 + b2.

    x : (rows, N) f32, w1/w2 : bf16, b1/b2 : (1, ·) f32.  bf16-in / f32-acc.
    """
    h = jnp.dot(x.astype(jnp.bfloat16), w1, preferred_element_type=jnp.float32) + b1
    h = _gelu(h)
    y = jnp.dot(h.astype(jnp.bfloat16), w2, preferred_element_type=jnp.float32) + b2
    return x + y


# -------------------------------------------------------------------------
# fused decoder kernel: grid = (ncores, layer)
# -------------------------------------------------------------------------
def _decoder_kernel(feat_ref, st_ref,
                    w1s_ref, w2s_ref, w1f_ref, w2f_ref, bias_ref,
                    st_out_ref,
                    feat_sc, st_sc):
    layer = pl.program_id(1)
    num_layers = pl.num_programs(1)

    Bc, C, N = feat_sc.shape
    K = st_sc.shape[1]
    HF = w1s_ref.shape[-1]

    # Load this core's batch slab into VMEM scratch once; it stays resident
    # across all layer steps (no HBM round trips between layers).
    @pl.when(layer == 0)
    def _():
        feat_sc[...] = feat_ref[...].astype(jnp.float32)
        st_sc[...] = st_ref[...].astype(jnp.float32)

    feat = feat_sc[...]          # (Bc, C, N) f32
    st = st_sc[...]              # (Bc, K, N) f32

    # Coalesced per-layer biases: one (4, BMAX) block, sliced statically.
    b1s = bias_ref[0:1, :HF]
    b2s = bias_ref[1:2, :N]
    b1f = bias_ref[2:3, :HF]
    b2f = bias_ref[3:4, :N]

    # ---- CSE interaction: struct tokens attend over feature channel slices.
    feat_bf = feat.astype(jnp.bfloat16)
    scale = 1.0 / math.sqrt(N)
    logits = jnp.einsum('bkn,bcn->bkc', st.astype(jnp.bfloat16), feat_bf,
                        preferred_element_type=jnp.float32) * scale   # (Bc, K, C)
    logits = logits - jnp.max(logits, axis=-1, keepdims=True)
    p = jnp.exp(logits)                                                # f32 on EUP
    attn = p * pl.reciprocal(jnp.sum(p, axis=-1, keepdims=True), approx=True)
    st = st + jnp.einsum('bkc,bcn->bkn', attn.astype(jnp.bfloat16), feat_bf,
                         preferred_element_type=jnp.float32)

    # ---- FFN on struct tokens (residual), row-stacked (Bc*K, N) slab.
    st = _ffn(st.reshape(Bc * K, N), w1s_ref[...], b1s, w2s_ref[...], b2s)
    st_sc[...] = st.reshape(Bc, K, N)

    # ---- FFN on features: the final block has no ffn_feat, so skip it there.
    # NOTE: at Bc*C rows ~<=128 this fits the vreg file; chunk with fori_loop
    # if the batch fold ever makes the slab much taller.
    @pl.when(layer < num_layers - 1)
    def _():
        f = _ffn(feat.reshape(Bc * C, N), w1f_ref[...], b1f, w2f_ref[...], b2f)
        feat_sc[...] = f.reshape(Bc, C, N)

    # ---- Only the final struct tokens are written to HBM.
    @pl.when(layer == num_layers - 1)
    def _():
        st_out_ref[...] = st.reshape(Bc, K, N).astype(st_out_ref.dtype)


# -------------------------------------------------------------------------
# wrapper
# -------------------------------------------------------------------------
def struct_token_decoder(feat_nchw, struct_tokens, params):
    """StructTokenDecoder.forward: all blocks fused into one pallas_call."""
    B, C, H, W = feat_nchw.shape
    N = H * W                        # embed_dims (token dim)
    K = struct_tokens.shape[1]
    L, _, HF = params["w1s"].shape   # num_layers, embed_dims, ffn_channels
    LF = params["w1f"].shape[0]      # = max(L - 1, 1): final block has no ffn_feat
    BMAX = params["bias"].shape[-1]

    assert C % 8 == 0 and K % 8 == 0, "sublane dims must be multiples of 8"
    assert N % 128 == 0 and HF % 128 == 0, "lane dims must be multiples of 128"

    # 2-way 'parallel' outer axis keeps both v7x TensorCores busy (one B/2
    # slab each); on single-TC v5e/v6e it only adds one extra weight sweep.
    ncores = 2 if (B % 2 == 0 and B >= 2) else 1
    Bc = B // ncores

    feat = feat_nchw.reshape(B, C, N)

    def wspec(shape):
        # stacked per-layer blocks, streamed (double-buffered) over the layer axis
        return pl.BlockSpec((pl.Squeezed(),) + shape, lambda c, l: (l, 0, 0))

    def wspec_feat(shape):
        # Only L-1 feat-FFN layers are stored; clamp so the last grid step
        # (which skips the feat FFN) reuses the resident block instead of
        # streaming dead weights.
        return pl.BlockSpec((pl.Squeezed(),) + shape,
                            lambda c, l: (jnp.minimum(l, LF - 1), 0, 0))

    st_out = pl.pallas_call(
        _decoder_kernel,
        out_shape=jax.ShapeDtypeStruct((B, K, N), struct_tokens.dtype),
        grid_spec=pltpu.PrefetchScalarGridSpec(
            num_scalar_prefetch=0,
            grid=(ncores, L),
            in_specs=[
                pl.BlockSpec((Bc, C, N), lambda c, l: (c, 0, 0)),   # feat slab
                pl.BlockSpec((Bc, K, N), lambda c, l: (c, 0, 0)),   # struct tokens
                wspec((N, HF)),          # w1s
                wspec((HF, N)),          # w2s
                wspec_feat((N, HF)),     # w1f (L-1 layers)
                wspec_feat((HF, N)),     # w2f (L-1 layers)
                wspec((4, BMAX)),        # coalesced biases (b1s,b2s,b1f,b2f)
            ],
            out_specs=pl.BlockSpec((Bc, K, N), lambda c, l: (c, 0, 0)),
            scratch_shapes=[
                pltpu.VMEM((Bc, C, N), jnp.float32),   # feat carried across layers
                pltpu.VMEM((Bc, K, N), jnp.float32),   # st   carried across layers
            ]),
        compiler_params=pltpu.CompilerParams(
            dimension_semantics=("parallel", "arbitrary")),
    )(feat, struct_tokens,
      params["w1s"], params["w2s"], params["w1f"], params["w2f"], params["bias"])
    return st_out


# -------------------------------------------------------------------------
# deterministic parameter init (synthetic weights, not a checkpoint)
# Weights: bf16 (MXU operands), stacked along a layer axis.  Biases: f32,
# coalesced into a single (L, 4, max(HF, N)) array.  The final block has no
# ffn_feat, so w1f/w2f only store L-1 layers.
# -------------------------------------------------------------------------
def init_params(key, num_layers, embed_dims, ffn_channels):
    L, N, HF = num_layers, embed_dims, ffn_channels
    LF = max(L - 1, 1)
    BMAX = max(HF, N)
    ks = jax.random.split(key, 8)

    def w(k, shape):
        return (0.02 * jax.random.normal(k, shape, jnp.float32)).astype(jnp.bfloat16)

    def b(k, shape):
        return 0.01 * jax.random.normal(k, shape, jnp.float32)

    b1s = b(ks[1], (L, HF))
    b2s = b(ks[3], (L, N))
    b1f = b(ks[5], (L, HF)).at[L - 1].set(0.0)    # unused (last block skips ffn_feat)
    b2f = b(ks[7], (L, N)).at[L - 1].set(0.0)

    bias = jnp.zeros((L, 4, BMAX), jnp.float32)
    bias = bias.at[:, 0, :HF].set(b1s)
    bias = bias.at[:, 1, :N].set(b2s)
    bias = bias.at[:, 2, :HF].set(b1f)
    bias = bias.at[:, 3, :N].set(b2f)

    return {
        "w1s": w(ks[0], (L, N, HF)),
        "w2s": w(ks[2], (L, HF, N)),
        "w1f": w(ks[4], (LF, N, HF)),   # only the L-1 blocks that have ffn_feat
        "w2f": w(ks[6], (LF, HF, N)),
        "bias": bias,
    }


if __name__ == "__main__":
    B, C, H, W = 2, 32, 16, 16
    K = 8                      # number of struct tokens (classes)
    N = H * W                  # embed_dims = 256
    HF = 256                   # feedforward_channels
    NUM_LAYERS = 3

    key = jax.random.PRNGKey(0)
    k_feat, k_st, k_params = jax.random.split(key, 3)

    feat = jax.random.normal(k_feat, (B, C, H, W), jnp.float32)
    struct_tokens = jax.random.normal(k_st, (B, K, N), jnp.float32)
    params = init_params(k_params, NUM_LAYERS, N, HF)

    out = jax.jit(struct_token_decoder)(feat, struct_tokens, params)
    out = jax.block_until_ready(out)

    assert out.shape == (B, K, N), out.shape
    assert bool(jnp.all(jnp.isfinite(out)))
    print("KERNEL_OK")
</pallas_src>

<mosaic_0001>
module attributes {stable_mosaic.version = 11 : i64} {
  func.func @_decoder_kernel(%arg0: i32, %arg1: i32, %arg2: memref<1x32x256xf32, #tpu.memory_space<vmem>>, %arg3: memref<1x8x256xf32, #tpu.memory_space<vmem>>, %arg4: memref<1x256x256xbf16, #tpu.memory_space<vmem>>, %arg5: memref<1x256x256xbf16, #tpu.memory_space<vmem>>, %arg6: memref<1x256x256xbf16, #tpu.memory_space<vmem>>, %arg7: memref<1x256x256xbf16, #tpu.memory_space<vmem>>, %arg8: memref<1x4x256xf32, #tpu.memory_space<vmem>>, %arg9: memref<1x8x256xf32, #tpu.memory_space<vmem>>, %arg10: memref<1x32x256xf32, #tpu.memory_space<vmem>>, %arg11: memref<1x8x256xf32, #tpu.memory_space<vmem>>) attributes {dimension_semantics = [#tpu.dimension_semantics<parallel>, #tpu.dimension_semantics<arbitrary>], iteration_bounds = array<i64: 2, 3>, scalar_prefetch = 0 : i64, scratch_operands = 2 : i64, tpu.core_type = #tpu.core_type<tc>, window_params = [{transform_indices = @transform_0, window_bounds = array<i64: 1, 32, 256>}, {transform_indices = @transform_1, window_bounds = array<i64: 1, 8, 256>}, {transform_indices = @transform_2, window_bounds = array<i64: 1, 256, 256>}, {transform_indices = @transform_3, window_bounds = array<i64: 1, 256, 256>}, {transform_indices = @transform_4, window_bounds = array<i64: 1, 256, 256>}, {transform_indices = @transform_5, window_bounds = array<i64: 1, 256, 256>}, {transform_indices = @transform_6, window_bounds = array<i64: 1, 4, 256>}, {transform_indices = @transform_7, window_bounds = array<i64: 1, 8, 256>}]} {
    %c0_i32 = arith.constant 0 : i32
    %0 = arith.cmpi eq, %arg1, %c0_i32 : i32
    %1 = arith.extui %0 : i1 to i32
    %c0_i32_0 = arith.constant 0 : i32
    %2 = arith.cmpi ne, %1, %c0_i32_0 : i32
    scf.if %2 {
      %c0_37 = arith.constant 0 : index
      %c0_38 = arith.constant 0 : index
      %c0_39 = arith.constant 0 : index
      %66 = vector.load %arg2[%c0_37, %c0_38, %c0_39] : memref<1x32x256xf32, #tpu.memory_space<vmem>>, vector<1x32x256xf32>
      %c0_40 = arith.constant 0 : index
      %c0_41 = arith.constant 0 : index
      %c0_42 = arith.constant 0 : index
      %67 = vector.load %arg10[%c0_40, %c0_41, %c0_42] : memref<1x32x256xf32, #tpu.memory_space<vmem>>, vector<1x32x256xf32>
      tpu.vector_store %arg10[%c0_40, %c0_41, %c0_42], %66 {strides = array<i32>} : memref<1x32x256xf32, #tpu.memory_space<vmem>>, vector<1x32x256xf32>,
      %c0_43 = arith.constant 0 : index
      %c0_44 = arith.constant 0 : index
      %c0_45 = arith.constant 0 : index
      %68 = vector.load %arg3[%c0_43, %c0_44, %c0_45] : memref<1x8x256xf32, #tpu.memory_space<vmem>>, vector<1x8x256xf32>
      %c0_46 = arith.constant 0 : index
      %c0_47 = arith.constant 0 : index
      %c0_48 = arith.constant 0 : index
      %69 = vector.load %arg11[%c0_46, %c0_47, %c0_48] : memref<1x8x256xf32, #tpu.memory_space<vmem>>, vector<1x8x256xf32>
      tpu.vector_store %arg11[%c0_46, %c0_47, %c0_48], %68 {strides = array<i32>} : memref<1x8x256xf32, #tpu.memory_space<vmem>>, vector<1x8x256xf32>,
    } else {
    }
    %c0 = arith.constant 0 : index
    %c0_1 = arith.constant 0 : index
    %c0_2 = arith.constant 0 : index
    %3 = vector.load %arg10[%c0, %c0_1, %c0_2] : memref<1x32x256xf32, #tpu.memory_space<vmem>>, vector<1x32x256xf32>
    %c0_3 = arith.constant 0 : index
    %c0_4 = arith.constant 0 : index
    %c0_5 = arith.constant 0 : index
    %4 = vector.load %arg11[%c0_3, %c0_4, %c0_5] : memref<1x8x256xf32, #tpu.memory_space<vmem>>, vector<1x8x256xf32>
    %c0_6 = arith.constant 0 : index
    %c0_7 = arith.constant 0 : index
    %c0_8 = arith.constant 0 : index
    %5 = vector.load %arg8[%c0_6, %c0_7, %c0_8] : memref<1x4x256xf32, #tpu.memory_space<vmem>>, vector<1x1x256xf32>
    %6 = vector.shape_cast %5 : vector<1x1x256xf32> to vector<1x256xf32>
    %c0_9 = arith.constant 0 : index
    %c1 = arith.constant 1 : index
    %c0_10 = arith.constant 0 : index
    %7 = vector.load %arg8[%c0_9, %c1, %c0_10] : memref<1x4x256xf32, #tpu.memory_space<vmem>>, vector<1x1x256xf32>
    %8 = vector.shape_cast %7 : vector<1x1x256xf32> to vector<1x256xf32>
    %c0_11 = arith.constant 0 : index
    %c2 = arith.constant 2 : index
    %c0_12 = arith.constant 0 : index
    %9 = vector.load %arg8[%c0_11, %c2, %c0_12] : memref<1x4x256xf32, #tpu.memory_space<vmem>>, vector<1x1x256xf32>
    %10 = vector.shape_cast %9 : vector<1x1x256xf32> to vector<1x256xf32>
    %c0_13 = arith.constant 0 : index
    %c3 = arith.constant 3 : index
    %c0_14 = arith.constant 0 : index
    %11 = vector.load %arg8[%c0_13, %c3, %c0_14] : memref<1x4x256xf32, #tpu.memory_space<vmem>>, vector<1x1x256xf32>
    %12 = vector.shape_cast %11 : vector<1x1x256xf32> to vector<1x256xf32>
    %13 = arith.truncf %3 : vector<1x32x256xf32> to vector<1x32x256xbf16>
    %14 = arith.truncf %4 : vector<1x8x256xf32> to vector<1x8x256xbf16>
    "tpu.trace_start"() <{level = 10 : i32, message = "bkn,bcn->bkc"}> : () -> ()
    %cst = arith.constant dense<0.000000e+00> : vector<1x8x32xf32>
    %15 = tpu.matmul %14, %13, %cst {dimension_numbers = #tpu.dot_dimension_numbers<[2], [2], [1], [1], [0, 0, 0, 1, 1, 1], [0], [0]>} : vector<1x8x256xbf16>, vector<1x32x256xbf16>, vector<1x8x32xf32> -> vector<1x8x32xf32>
    "tpu.trace_stop"() : () -> ()
    %cst_15 = arith.constant 6.250000e-02 : f32
    %16 = vector.broadcast %cst_15 : f32 to vector<1x8x32xf32>
    %17 = arith.mulf %15, %16 : vector<1x8x32xf32>
    %cst_16 = arith.constant dense<0xFF800000> : vector<1x8xf32>
    %18 = vector.multi_reduction <maximumf>, %17, %cst_16 [2] : vector<1x8x32xf32> to vector<1x8xf32>
    %19 = vector.shape_cast %18 : vector<1x8xf32> to vector<1x8x1xf32>
    %20 = vector.broadcast %19 : vector<1x8x1xf32> to vector<1x8x32xf32>
    %21 = arith.subf %17, %20 : vector<1x8x32xf32>
    %22 = math.exp %21 : vector<1x8x32xf32>
    %cst_17 = arith.constant dense<0.000000e+00> : vector<1x8xf32>
    %23 = vector.multi_reduction <add>, %22, %cst_17 [2] : vector<1x8x32xf32> to vector<1x8xf32>
    %24 = vector.shape_cast %23 : vector<1x8xf32> to vector<1x8x1xf32>
    %25 = tpu.reciprocal %24 {approx = true} : vector<1x8x1xf32> -> vector<1x8x1xf32>
    %26 = vector.broadcast %25 : vector<1x8x1xf32> to vector<1x8x32xf32>
    %27 = arith.mulf %22, %26 : vector<1x8x32xf32>
    %28 = arith.truncf %27 : vector<1x8x32xf32> to vector<1x8x32xbf16>
    "tpu.trace_start"() <{level = 10 : i32, message = "bkc,bcn->bkn"}> : () -> ()
    %cst_18 = arith.constant dense<0.000000e+00> : vector<1x8x256xf32>
    %29 = tpu.matmul %28, %13, %cst_18 {dimension_numbers = #tpu.dot_dimension_numbers<[2], [1], [1], [2], [0, 0, 0, 1, 1, 2], [0], [0]>} : vector<1x8x32xbf16>, vector<1x32x256xbf16>, vector<1x8x256xf32> -> vector<1x8x256xf32>
    "tpu.trace_stop"() : () -> ()
    %30 = arith.addf %4, %29 : vector<1x8x256xf32>
    %31 = vector.shape_cast %30 : vector<1x8x256xf32> to vector<8x256xf32>
    %c0_19 = arith.constant 0 : index
    %c0_20 = arith.constant 0 : index
    %c0_21 = arith.constant 0 : index
    %32 = vector.load %arg4[%c0_19, %c0_20, %c0_21] : memref<1x256x256xbf16, #tpu.memory_space<vmem>>, vector<1x256x256xbf16>
    %33 = vector.shape_cast %32 : vector<1x256x256xbf16> to vector<256x256xbf16>
    %c0_22 = arith.constant 0 : index
    %c0_23 = arith.constant 0 : index
    %c0_24 = arith.constant 0 : index
    %34 = vector.load %arg5[%c0_22, %c0_23, %c0_24] : memref<1x256x256xbf16, #tpu.memory_space<vmem>>, vector<1x256x256xbf16>
    %35 = vector.shape_cast %34 : vector<1x256x256xbf16> to vector<256x256xbf16>
    %36 = arith.truncf %31 : vector<8x256xf32> to vector<8x256xbf16>
    %cst_25 = arith.constant dense<0.000000e+00> : vector<8x256xf32>
    %37 = tpu.matmul %36, %33, %cst_25 {dimension_numbers = #tpu.dot_dimension_numbers<[1], [0], [0], [1], [0, 0, 1, 1], [], []>} : vector<8x256xbf16>, vector<256x256xbf16>, vector<8x256xf32> -> vector<8x256xf32>
    %38 = vector.broadcast %6 : vector<1x256xf32> to vector<8x256xf32>
    %39 = arith.addf %37, %38 : vector<8x256xf32>
    %cst_26 = arith.constant 5.000000e-01 : f32
    %40 = vector.broadcast %cst_26 : f32 to vector<8x256xf32>
    %41 = arith.mulf %40, %39 : vector<8x256xf32>
    %cst_27 = arith.constant 4.471500e-02 : f32
    %42 = vector.broadcast %cst_27 : f32 to vector<8x256xf32>
    %43 = arith.mulf %42, %39 : vector<8x256xf32>
    %44 = arith.mulf %43, %39 : vector<8x256xf32>
    %45 = arith.mulf %44, %39 : vector<8x256xf32>
    %46 = arith.addf %39, %45 : vector<8x256xf32>
    %cst_28 = arith.constant 0.797884583 : f32
    %47 = vector.broadcast %cst_28 : f32 to vector<8x256xf32>
    %48 = arith.mulf %47, %46 : vector<8x256xf32>
    %49 = math.tanh %48 : vector<8x256xf32>
    %cst_29 = arith.constant 1.000000e+00 : f32
    %50 = vector.broadcast %cst_29 : f32 to vector<8x256xf32>
    %51 = arith.addf %50, %49 : vector<8x256xf32>
    %52 = arith.mulf %41, %51 : vector<8x256xf32>
    %53 = arith.truncf %52 : vector<8x256xf32> to vector<8x256xbf16>
    %cst_30 = arith.constant dense<0.000000e+00> : vector<8x256xf32>
    %54 = tpu.matmul %53, %35, %cst_30 {dimension_numbers = #tpu.dot_dimension_numbers<[1], [0], [0], [1], [0, 0, 1, 1], [], []>} : vector<8x256xbf16>, vector<256x256xbf16>, vector<8x256xf32> -> vector<8x256xf32>
    %55 = vector.broadcast %8 : vector<1x256xf32> to vector<8x256xf32>
    %56 = arith.addf %54, %55 : vector<8x256xf32>
    %57 = arith.addf %31, %56 : vector<8x256xf32>
    %58 = vector.shape_cast %57 : vector<8x256xf32> to vector<1x8x256xf32>
    %c0_31 = arith.constant 0 : index
    %c0_32 = arith.constant 0 : index
    %c0_33 = arith.constant 0 : index
    %59 = vector.load %arg11[%c0_31, %c0_32, %c0_33] : memref<1x8x256xf32, #tpu.memory_space<vmem>>, vector<1x8x256xf32>
    tpu.vector_store %arg11[%c0_31, %c0_32, %c0_33], %58 {strides = array<i32>} : memref<1x8x256xf32, #tpu.memory_space<vmem>>, vector<1x8x256xf32>,
    %c2_i32 = arith.constant 2 : i32
    %60 = arith.cmpi slt, %arg1, %c2_i32 : i32
    %61 = arith.extui %60 : i1 to i32
    %c0_i32_34 = arith.constant 0 : i32
    %62 = arith.cmpi ne, %61, %c0_i32_34 : i32
    scf.if %62 {
      %66 = vector.shape_cast %3 : vector<1x32x256xf32> to vector<32x256xf32>
      %c0_37 = arith.constant 0 : index
      %c0_38 = arith.constant 0 : index
      %c0_39 = arith.constant 0 : index
      %67 = vector.load %arg6[%c0_37, %c0_38, %c0_39] : memref<1x256x256xbf16, #tpu.memory_space<vmem>>, vector<1x256x256xbf16>
      %68 = vector.shape_cast %67 : vector<1x256x256xbf16> to vector<256x256xbf16>
      %c0_40 = arith.constant 0 : index
      %c0_41 = arith.constant 0 : index
      %c0_42 = arith.constant 0 : index
      %69 = vector.load %arg7[%c0_40, %c0_41, %c0_42] : memref<1x256x256xbf16, #tpu.memory_space<vmem>>, vector<1x256x256xbf16>
      %70 = vector.shape_cast %69 : vector<1x256x256xbf16> to vector<256x256xbf16>
      %71 = arith.truncf %66 : vector<32x256xf32> to vector<32x256xbf16>
      %cst_43 = arith.constant dense<0.000000e+00> : vector<32x256xf32>
      %72 = tpu.matmul %71, %68, %cst_43 {dimension_numbers = #tpu.dot_dimension_numbers<[1], [0], [0], [1], [0, 0, 1, 1], [], []>} : vector<32x256xbf16>, vector<256x256xbf16>, vector<32x256xf32> -> vector<32x256xf32>
      %73 = vector.broadcast %10 : vector<1x256xf32> to vector<32x256xf32>
      %74 = arith.addf %72, %73 : vector<32x256xf32>
      %cst_44 = arith.constant 5.000000e-01 : f32
      %75 = vector.broadcast %cst_44 : f32 to vector<32x256xf32>
      %76 = arith.mulf %75, %74 : vector<32x256xf32>
      %cst_45 = arith.constant 4.471500e-02 : f32
      %77 = vector.broadcast %cst_45 : f32 to vector<32x256xf32>
      %78 = arith.mulf %77, %74 : vector<32x256xf32>
      %79 = arith.mulf %78, %74 : vector<32x256xf32>
      %80 = arith.mulf %79, %74 : vector<32x256xf32>
      %81 = arith.addf %74, %80 : vector<32x256xf32>
      %cst_46 = arith.constant 0.797884583 : f32
      %82 = vector.broadcast %cst_46 : f32 to vector<32x256xf32>
      %83 = arith.mulf %82, %81 : vector<32x256xf32>
      %84 = math.tanh %83 : vector<32x256xf32>
      %cst_47 = arith.constant 1.000000e+00 : f32
      %85 = vector.broadcast %cst_47 : f32 to vector<32x256xf32>
      %86 = arith.addf %85, %84 : vector<32x256xf32>
      %87 = arith.mulf %76, %86 : vector<32x256xf32>
      %88 = arith.truncf %87 : vector<32x256xf32> to vector<32x256xbf16>
      %cst_48 = arith.constant dense<0.000000e+00> : vector<32x256xf32>
      %89 = tpu.matmul %88, %70, %cst_48 {dimension_numbers = #tpu.dot_dimension_numbers<[1], [0], [0], [1], [0, 0, 1, 1], [], []>} : vector<32x256xbf16>, vector<256x256xbf16>, vector<32x256xf32> -> vector<32x256xf32>
      %90 = vector.broadcast %12 : vector<1x256xf32> to vector<32x256xf32>
      %91 = arith.addf %89, %90 : vector<32x256xf32>
      %92 = arith.addf %66, %91 : vector<32x256xf32>
      %93 = vector.shape_cast %92 : vector<32x256xf32> to vector<1x32x256xf32>
      %c0_49 = arith.constant 0 : index
      %c0_50 = arith.constant 0 : index
      %c0_51 = arith.constant 0 : index
      %94 = vector.load %arg10[%c0_49, %c0_50, %c0_51] : memref<1x32x256xf32, #tpu.memory_space<vmem>>, vector<1x32x256xf32>
      tpu.vector_store %arg10[%c0_49, %c0_50, %c0_51], %93 {strides = array<i32>} : memref<1x32x256xf32, #tpu.memory_space<vmem>>, vector<1x32x256xf32>,
    } else {
    }
    %c2_i32_35 = arith.constant 2 : i32
    %63 = arith.cmpi eq, %arg1, %c2_i32_35 : i32
    %64 = arith.extui %63 : i1 to i32
    %c0_i32_36 = arith.constant 0 : i32
    %65 = arith.cmpi ne, %64, %c0_i32_36 : i32
    scf.if %65 {
      %66 = vector.shape_cast %57 : vector<8x256xf32> to vector<1x8x256xf32>
      %c0_37 = arith.constant 0 : index
      %c0_38 = arith.constant 0 : index
      %c0_39 = arith.constant 0 : index
      %67 = vector.load %arg9[%c0_37, %c0_38, %c0_39] : memref<1x8x256xf32, #tpu.memory_space<vmem>>, vector<1x8x256xf32>
      tpu.vector_store %arg9[%c0_37, %c0_38, %c0_39], %66 {strides = array<i32>} : memref<1x8x256xf32, #tpu.memory_space<vmem>>, vector<1x8x256xf32>,
    } else {
    }
    return
  }
  func.func @transform_0(%arg0: i32, %arg1: i32) -> (i32, i32, i32) {
    %c0_i32 = arith.constant 0 : i32
    %c0_i32_0 = arith.constant 0 : i32
    %c0_i32_1 = arith.constant 0 : i32
    return %arg0, %c0_i32, %c0_i32_0 : i32, i32, i32
  }
  func.func @transform_1(%arg0: i32, %arg1: i32) -> (i32, i32, i32) {
    %c0_i32 = arith.constant 0 : i32
    %c0_i32_0 = arith.constant 0 : i32
    %c0_i32_1 = arith.constant 0 : i32
    return %arg0, %c0_i32, %c0_i32_0 : i32, i32, i32
  }
  func.func @transform_2(%arg0: i32, %arg1: i32) -> (i32, i32, i32) {
    %c0_i32 = arith.constant 0 : i32
    %c0_i32_0 = arith.constant 0 : i32
    %c0_i32_1 = arith.constant 0 : i32
    return %arg1, %c0_i32, %c0_i32_0 : i32, i32, i32
  }
  func.func @transform_3(%arg0: i32, %arg1: i32) -> (i32, i32, i32) {
    %c0_i32 = arith.constant 0 : i32
    %c0_i32_0 = arith.constant 0 : i32
    %c0_i32_1 = arith.constant 0 : i32
    return %arg1, %c0_i32, %c0_i32_0 : i32, i32, i32
  }
  func.func @transform_4(%arg0: i32, %arg1: i32) -> (i32, i32, i32) {
    %c1_i32 = arith.constant 1 : i32
    %0 = arith.minsi %arg1, %c1_i32 : i32
    %c0_i32 = arith.constant 0 : i32
    %c0_i32_0 = arith.constant 0 : i32
    %c0_i32_1 = arith.constant 0 : i32
    return %0, %c0_i32, %c0_i32_0 : i32, i32, i32
  }
  func.func @transform_5(%arg0: i32, %arg1: i32) -> (i32, i32, i32) {
    %c1_i32 = arith.constant 1 : i32
    %0 = arith.minsi %arg1, %c1_i32 : i32
    %c0_i32 = arith.constant 0 : i32
    %c0_i32_0 = arith.constant 0 : i32
    %c0_i32_1 = arith.constant 0 : i32
    return %0, %c0_i32, %c0_i32_0 : i32, i32, i32
  }
  func.func @transform_6(%arg0: i32, %arg1: i32) -> (i32, i32, i32) {
    %c0_i32 = arith.constant 0 : i32
    %c0_i32_0 = arith.constant 0 : i32
    %c0_i32_1 = arith.constant 0 : i32
    return %arg1, %c0_i32, %c0_i32_0 : i32, i32, i32
  }
  func.func @transform_7(%arg0: i32, %arg1: i32) -> (i32, i32, i32) {
    %c0_i32 = arith.constant 0 : i32
    %c0_i32_0 = arith.constant 0 : i32
    %c0_i32_1 = arith.constant 0 : i32
    return %arg0, %c0_i32, %c0_i32_0 : i32, i32, i32
  }
}

</mosaic_0001>

<bundles_post_ra>
// kernel: struct_token_decoder.1
= control target key start
LH: loop header
LB: loop body
LE: loop exit
PB: predicated region body
PF: predicated region fallthrough
CT: control target
= control target key end

     0   :  { %s3375_s0 = inlined_call_operand.vmem [shape: f32[2,32,256], index: 0, kind: input, shape index: {}]   ;;  %s3376_s1 = inlined_call_operand.vmem [shape: f32[2,8,256], index: 1, kind: input, shape index: {}]   ;;  %s3377_s2 = inlined_call_operand.hbm [shape: bf16[3,256,256], index: 2, kind: input, shape index: {}]   ;;  %s3378_s3 = inlined_call_operand.hbm [shape: bf16[3,256,256], index: 3, kind: input, shape index: {}]   ;;  %s3379_s4 = inlined_call_operand.vmem [shape: bf16[2,256,256], index: 4, kind: input, shape index: {}]   ;;  %s3380_s5 = inlined_call_operand.hbm [shape: bf16[2,256,256], index: 5, kind: input, shape index: {}]   ;;  %s3381_s6 = inlined_call_operand.vmem [shape: f32[3,4,256], index: 6, kind: input, shape index: {}]   ;;  %s3382_s7 = inlined_call_operand.hbm [shape: f32[2,8,256], index: 7, kind: output, shape index: {}]  }
   0x1   :  { %3404 = sst [smem:[#allocation30_spill]] %s3375_s0 }
   0x2   :  { %3405 = sst [smem:[#allocation31_spill]] %s3376_s1 }
   0x3   :  { %3406 = sst [smem:[#allocation32_spill]] %s3377_s2 }
   0x4   :  { %3407 = sst [smem:[#allocation33_spill]] %s3378_s3 }
   0x5   :  { %3408 = sst [smem:[#allocation34_spill]] %s3379_s4 }
   0x6   :  { %3409 = sst [smem:[#allocation35_spill]] %s3380_s5 }
   0x7   :  { %3410 = sst [smem:[#allocation36_spill]] %s3381_s6 }
   0x8   :  { %3411 = sst [smem:[#allocation37_spill]] %s3382_s7 }
   0x9   :  { %12 = vsyncpa [#allocation5], 0 }
   0xa   :  { %14 = vsyncpa [#allocation5 + $0x1], 0 }
   0xb   :  { %15 = vsyncpa [#allocation8], 0 }
   0xc   :  { %17 = vsyncpa [#allocation8 + $0x1], 0 }
   0xd   :  { %18 = vsyncpa [#allocation6], 0 }
   0xe   :  { %20 = vsyncpa [#allocation6 + $0x1], 0  ;;  %s2768_s24 = smov 0   ;;  %s2770_s25 = smov 0  }
   0xf   :  { %s2772_s26 = smov 0   ;;  %s2774_s27 = smov 0  }
  0x10   :  { %s2776_s28 = smov 0   ;;  %s2778_s29 = smov 0  }
  0x11   :  { %s2780_s30 = smov 0   ;;  %s2782_s8 = smov 0  }
  0x12   :  { %s2784_s9 = smov 0   ;;  %s2786_s10 = smov 0  }
  0x13   :  { %s2788_s11 = smov 0   ;;  %s2790_s12 = smov 0  }
  0x14   :  { %s2792_s13 = smov 0   ;;  %s2794_s14 = smov 0  }
  0x15 LB: > { %3412 = sst [smem:[#allocation15_spill]] %s2667_s24  ;;  %s2837_s15 = sadd.s32 4294967295, %s2719_s14   ;;  %s2719_s14 = sphi %s2794_s14, %s26_s14   ;;  %s2715_s13 = sphi %s2792_s13, %s3467_s13   ;;  %s2711_s12 = sphi %s2790_s12, %s3466_s12   ;;  %s2707_s11 = sphi %s2788_s11, %s3465_s11   ;;  %s2703_s10 = sphi %s2786_s10, %s3464_s10   ;;  %s2699_s9 = sphi %s2784_s9, %s3463_s9   ;;  %s2695_s8 = sphi %s2782_s8, %s3462_s8   ;;  %s2691_s30 = sphi %s2780_s30, %s3461_s30   ;;  %s2687_s29 = sphi %s2778_s29, %s3460_s29   ;;  %s2683_s28 = sphi %s2776_s28, %s3471_s28   ;;  %s2679_s27 = sphi %s2774_s27, %s3470_s27   ;;  %s2675_s26 = sphi %s2772_s26, %s3458_s26   ;;  %s2671_s25 = sphi %s2770_s25, %s3469_s25   ;;  %s2667_s24 = sphi %s2768_s24, %s3468_s24  }
  0x16   : > { %3413 = sst [smem:[#allocation16_spill]] %s2675_s26  ;;  %s1952_s16 = sadd.s32 4294967294, %s2719_s14  }
  0x17   : > { %3414 = sst [smem:[#allocation17_spill]] %s2687_s29  ;;  %s35_s17 = sadd.s32 1, %s2711_s12 }
  0x18   : > { %3415 = sst [smem:[#allocation18_spill]] %s2695_s8  ;;  %s38_s18 = sadd.s32 1, %s2715_s13 }
  0x19   : > { %3416 = sst [smem:[#allocation19_spill]] %s2699_s9  ;;  %p36_p0 = scmp.ge.s32.totalorder %s35_s17, 3 }
  0x1a   : > { %3417 = sst [smem:[#allocation20_spill]] %s2703_s10  ;;  %s97_s19 = sadd.s32 1, %s2699_s9 }
  0x1b   : > { %3418 = sst [smem:[#allocation21_spill]] %s2711_s12  ;;  %p104_p1 = scmp.ne.s32.totalorder %s2699_s9, %s2695_s8 }
  0x1c   : > { %3419 = sst [smem:[#allocation22_spill]] %s2715_s13  ;;  %p105_p2 = scmp.eq.s32.totalorder %s2719_s14, 0 }
  0x1d   : > { %s3473_s17 = smov (%p36_p0, %s35_s17), 0  ;;  %s3475_s18 = smov (!%p36_p0, %s38_s18), %s2715_s13 }
  0x1e   : > { %3420 = sst [smem:[#allocation23_spill]] %s3473_s17  ;;  %s94_s20 = ssub.s32 %s2711_s12, %s3473_s17 }
  0x1f   : > { %p2853_p3 = por %p105_p2, %p104_p1  ;;  %p40_p4 = scmp.ge.s32.totalorder %s3475_s18, 2 }
  0x20   : > { %p95_p5 = scmp.eq.s32.totalorder %s94_s20, 0  ;;  %p110_p6 = scmp.ne.s32.totalorder %s2695_s8, %s2691_s30 }
  0x21   : > { %p3393_p7 = scmp.eq.s32.totalorder %s2837_s15, 0  ;;  %s3477_s18 = smov (%p40_p4, %s3475_s18), 0 }
  0x22   : > { %3422 = sst [smem:[#allocation24_spill]] %s3477_s18  ;;  %s232_s7 = ssub.s32 %s2715_s13, %s3477_s18 }
  0x23   : > { %s2862_s22 = scalar_select %p95_p5, %s2699_s9, %s97_s19  }
  0x24   : > { %p2866_p8 = por %p3393_p7, %p110_p6  ;;  %p233_p9 = scmp.eq.s32.totalorder %s232_s7, 0 }
  0x25   : > { %3423 = sst [smem:[#allocation25_spill]] %s2862_s22  ;;  %s235_s30 = sadd.s32 1, %s2675_s26 }
  0x26   : > { %p245_p10 = scmp.ne.s32.totalorder %s2675_s26, %s2671_s25  ;;  %p246_p11 = scmp.eq.s32.totalorder %s2837_s15, 5 }
  0x27   : > { %s2877_s20 = scalar_select %p233_p9, %s2675_s26, %s235_s30  }
  0x28   : > { %p2879_p12 = por %p246_p11, %p245_p10  ;;  %p251_p13 = scmp.ne.s32.totalorder %s2671_s25, %s2667_s24 }
  0x29   : > { %3425 = sst [smem:[#allocation26_spill]] %s2877_s20  ;;  %p252_p0 = scmp.eq.s32.totalorder %s1952_s16, 5 }
  0x2a   : > { %s3426_s19 = scalar_select %p2879_p12, 1, 0 }
  0x2b   : > { %p3392_p1 = scmp.lt.s32.totalorder %s2719_s14, 6  ;;  %s3389_s22 = sand.u32 1, %s2699_s9  }
  0x2c   : > { %3427 = sst [smem:[#allocation27_spill]] %s3426_s19  ;;  %p2887_p4 = por %p252_p0, %p251_p13 }
  0x2d   : > { %s2893_s7 = sshll.u32 %s3389_s22, 8  ;;  %s2120_s18 = sshll.u32 %s2711_s12, 12 }
  0x2e   : > { %s3428_s6 = scalar_select %p2887_p4, 1, 0 }
  0x2f   : > { %p2900_p5 = pnand %p3392_p1, %p2853_p3  ;;  %s309_s16 = sand.u32 1, %s2719_s14  }
  0x30   : > { %3429 = sst [smem:[#allocation28_spill]] %s3428_s6  ;;  %s313_s6 = scalar_lea.vmem [#allocation7], %s2893_s7 }
  0x31   : > { %s3431_s3 = sld [smem:[#allocation33_spill]]  ;;  %s320_s24 = sshll.u32 %s313_s6, 4  ;;  %s321_s24 = int_to_ptr.vmem [resolvable:$true] %s320_s24 }
  0x32   : > { %p1964_p6 = scmp.ge.s32.totalorder %s2719_s14, 1  ;;  %s2912_s22 = scalar_lea.sflag [#allocation8], %s309_s16 }
  0x33   : > { %p2485_p9 = pneg %p2900_p5  ;;  %s2496_s21 = scalar_lea.vmem %s321_s24, 4096 }
  0x34   : > { %p2497_p3 = scmp.ne.s32.totalorder %s321_s24, %s2496_s21  ;;  %s2721_s19 = smov [#allocation7]  }
  0x35   : > { %s2501_s4 = sshll.u32 %s2721_s19, 4  ;;  %s2502_s4 = int_to_ptr.vmem [resolvable:$false] %s2501_s4 }
  0x36   : > { %p2499_p10 = pnand %p2497_p3, %p2485_p9  ;;  %s2503_s1 = scalar_lea.vmem %s2502_s4, 8192 }
  0x37   : > { %s319_s26 = scalar_lea.hbm %s3431_s3, %s2120_s18  ;;  %p2504_p13 = scmp.lt.s32.totalorder %s321_s24, %s2502_s4 }
  0x38   : > { %p2500_p11 = pneg %p2499_p10  ;;  %p2505_p0 = scmp.lt.s32.totalorder %s2503_s1, %s2496_s21 }
  0x3a   : > { %p2506_p1 = por %p2505_p0, %p2504_p13 }
  0x3c   : > { %p2507_p7 = pnand %p2506_p1, %p2500_p11 }
  0x3e   : > { %2510 = shalt.err (!%p2507_p7)
}
  0x3f   : > { %s3395_s6 = smov 128   ;;  %s2723_s13 = smov 8  }
  0x40   : > { %2142 = dma.hbm_to_vmem [thread:$0]  (!%p2900_p5), %s319_s26, 4096, %s321_s24, %s2912_s22, %s3395_s6, %s3395_s6, %s2723_s13  }
  0x41   : > { %p371_p3 = scmp.lt.s32.totalorder %s2719_s14, 7  ;;  %s3433_s2 = sld [smem:[#allocation32_spill]] }
  0x42   : > { %s292_s16 = scalar_lea.vmem [#allocation4], %s2893_s7  ;;  %s3434_s3 = sand.u32 1, %s2699_s9  }
  0x43   : > { %p2928_p10 = pnand %p1964_p6, %p371_p3  ;;  %s299_s21 = sshll.u32 %s292_s16, 4  ;;  %s300_s21 = int_to_ptr.vmem [resolvable:$true] %s299_s21 }
  0x44   : > { %s289_s0 = scalar_lea.sflag [#allocation5], %s3434_s3  ;;  %s2524_s10 = scalar_lea.vmem %s300_s21, 4096 }
  0x45   : > { %p2525_p7 = scmp.ne.s32.totalorder %s300_s21, %s2524_s10  ;;  %s2724_s24 = smov [#allocation4]  }
  0x46   : > { %s2529_s26 = sshll.u32 %s2724_s24, 4  ;;  %s2530_s26 = int_to_ptr.vmem [resolvable:$false] %s2529_s26 }
  0x47   : > { %s298_s19 = scalar_lea.hbm %s3433_s2, %s2120_s18  ;;  %p2527_p1 = pnand %p2525_p7, %p2485_p9 }
  0x48   : > { %s2531_s6 = scalar_lea.vmem %s2530_s26, 8192  ;;  %p2532_p6 = scmp.lt.s32.totalorder %s300_s21, %s2530_s26 }
  0x49   : > { %p2528_p11 = pneg %p2527_p1  ;;  %p2533_p13 = scmp.lt.s32.totalorder %s2531_s6, %s2524_s10 }
  0x4b   : > { %p2534_p0 = por %p2533_p13, %p2532_p6 }
  0x4d   : > { %p2535_p3 = pnand %p2534_p0, %p2528_p11 }
  0x4f   : > { %2538 = shalt.err (!%p2535_p3)
}
  0x50   : > { %s3435_s18 = smov 128   ;;  %p176_p9 = scmp.lt.s32.totalorder %s2711_s12, 1 }
  0x51   : > { %2139 = dma.hbm_to_vmem [thread:$0]  (!%p2900_p5), %s298_s19, 4096, %s300_s21, %s289_s0, %s3435_s18, %s3435_s18, %s2723_s13  }
  0x52   : > { %p178_p7 = scmp.lt.s32.totalorder %s3473_s17, 1  ;;  %s183_s3 = sadd.s32 1, %s2687_s29 }
  0x53   : > { %s177_s10 = scalar_select %p176_p9, %s2711_s12, 1 }
  0x54   : > { %s179_s7 = scalar_select %p178_p7, %s3473_s17, 1 }
  0x55   : > { %p190_p1 = scmp.ne.s32.totalorder %s2687_s29, %s2683_s28  ;;  %p196_p11 = scmp.ne.s32.totalorder %s2683_s28, %s2679_s27 }
  0x56   : > { %s180_s30 = ssub.s32 %s177_s10, %s179_s7  ;;  %s344_s6 = sand.u32 1, %s2687_s29  }
  0x57   : > { %p181_p6 = scmp.eq.s32.totalorder %s180_s30, 0  ;;  %p192_p13 = por %p190_p1, %p105_p2 }
  0x58   : > { %p3436_p0 = scmp.eq.s32.totalorder %s2837_s15, 0  ;;  %s1961_s20 = sshll.u32 %s344_s6, 8 }
  0x59   : > { %s2967_s0 = scalar_select %p181_p6, %s2687_s29, %s183_s3  }
  0x5a   : > { %p2962_p3 = por %p196_p11, %p3436_p0  ;;  %s2122_s19 = sshll.u32 %s177_s10, 12 }
  0x5b   : > { %3438 = sst [smem:[#allocation29_spill]] %s2967_s0  ;;  %s346_s26 = scalar_lea.vmem [#allocation9], %s1961_s20 }
  0x5c   : > { %s3439_s5 = sld [smem:[#allocation35_spill]]  ;;  %s355_s27 = sshll.u32 %s346_s26, 4  ;;  %s356_s27 = int_to_ptr.vmem [resolvable:$true] %s355_s27 }
  0x5d   : > { %p3440_p5 = scmp.lt.s32.totalorder %s2719_s14, 6  ;;  %s2552_s30 = scalar_lea.vmem %s356_s27, 4096 }
  0x5e   : > { %p2553_p7 = scmp.ne.s32.totalorder %s356_s27, %s2552_s30  ;;  %s2725_s3 = smov [#allocation9]  }
  0x5f   : > { %p2974_p9 = pnand %p3440_p5, %p192_p13  ;;  %s2557_s10 = sshll.u32 %s2725_s3, 4  ;;  %s2558_s10 = int_to_ptr.vmem [resolvable:$false] %s2557_s10 }
  0x60   : > { %s2559_s6 = scalar_lea.vmem %s2558_s10, 8192  ;;  %p2560_p6 = scmp.lt.s32.totalorder %s356_s27, %s2558_s10 }
  0x61   : > { %p2541_p2 = pneg %p2974_p9  ;;  %p2561_p0 = scmp.lt.s32.totalorder %s2559_s6, %s2552_s30 }
  0x62   : > { %s354_s24 = scalar_lea.hbm %s3439_s5, %s2122_s19 }
  0x63   : > { %p2555_p1 = pnand %p2553_p7, %p2541_p2  ;;  %p2562_p4 = por %p2561_p0, %p2560_p6 }
  0x65   : > { %p2556_p11 = pneg %p2555_p1 }
  0x67   : > { %p2563_p12 = pnand %p2562_p4, %p2556_p11 }
  0x69   : > { %2566 = shalt.err (!%p2563_p12)
}
  0x6a   : > { %2145 = dma.hbm_to_vmem [thread:$0]  (!%p2974_p9), %s354_s24, 4096, %s356_s27, %s2912_s22, %s3435_s18, %s3435_s18, %s2723_s13  }
  0x6b   : > { %375 = sbr.rel (%p2928_p10) target bundleno = 1854 (0x73e), region = 48  ;;  %s377_s20 = sand.u32 (!%p2928_p10), 1, %s2695_s8  }
  0x6c   : > { %s1965_s19 = sshll.u32 (!%p2928_p10), %s377_s20, 8  ;;  %s378_s16 = scalar_lea.sflag (!%p2928_p10), [#allocation5], %s377_s20 }
  0x6d   : > { %s2989_s21 = scalar_lea.vmem (!%p2928_p10), [#allocation4], %s1965_s19 }
  0x70   : > { %2650 = dma.done.wait (%p2866_p8), %s378_s16, 4096  }
  0x71   : > { %2652 = vsyncadd (%p2866_p8), %s378_s16, 4294963200  ;;  %s386_s26 = sand.u32 1, %s2837_s15   ;;  %s2996_s22 = scalar_lea.vmem [#allocation7], %s1965_s19 }
  0x72   : > { %s387_s7 = scalar_lea.sflag [#allocation8], %s386_s26 }
  0x73   : > { %2654 = dma.done.wait (%p2866_p8), %s387_s7, 4096  }
  0x74   : > { %2656 = vsyncadd (%p2866_p8), %s387_s7, 4294963200  ;;  %s397_s13 = sand.u32 1, %s2683_s28  }
  0x75   : > { %s1967_s1 = sshll.u32 %s397_s13, 8 }
  0x76   : > { %s3003_s18 = scalar_lea.vmem [#allocation9], %s1967_s1 }
  0x77   : > { %2658 = dma.done.wait (%p2962_p3), %s387_s7, 4096  }
  0x78   : > { %2660 = vsyncadd (%p2962_p3), %s387_s7, 4294963200  ;;  %s3442_s15 = sld [smem:[#allocation20_spill]]  ;;  %s3399_s23 = sand.u32 1, %s2671_s25  }
  0x79   : > { %p462_p8 = scmp.lt.s32.totalorder %s2707_s11, 1  ;;  %s1968_s24 = sshll.u32 %s3399_s23, 4 }
  0x7a   : > { %s3443_s20 = sld [smem:[#allocation30_spill]]  ;;  %s3034_s4 = scalar_lea.vmem [#allocation10], %s1968_s24 }
  0x7b   : > { %s463_s27 = scalar_select %p462_p8, %s2707_s11, 1 }
  0x7c   : > { %s3444_s7 = sld [smem:[#allocation31_spill]] }
  0x7d   : > { %s2123_s3 = sshll.u32 %s463_s27, 6  ;;  %s2124_s10 = sshll.u32 %s463_s27, 4 }
  0x7e   : > { %p472_p12 = scmp.lt.s32.totalorder %s3442_s15, 1  ;;  %p483_p4 = scmp.lt.s32.totalorder %s3442_s15, 2 }
  0x7f   : > { %s3445_s23 = sld [smem:[#allocation34_spill]]  ;;  %p1980_p10 = scmp.ne.s32.totalorder %s3442_s15, 0 }
  0x80   : > { %s473_s30 = scalar_select %p472_p12, %s3442_s15, 1 }
  0x81   : > { %s466_s19 = scalar_lea.vmem %s3443_s20, %s2123_s3  ;;  %s3446_s27 = sld [smem:[#allocation36_spill]] }
  0x82   : > { %s471_s13 = scalar_lea.vmem %s3444_s7, %s2124_s10  ;;  %s3479_s30 = smov (!%p472_p12, %s473_s30), 1 }
  0x83   : > { %s484_s1 = scalar_select %p483_p4, %s3442_s15, 2 }
  0x84   : > { %s2125_s2 = sshll.u32 %s3479_s30, 8  ;;  %492 = sbr.rel (%p1980_p10) target bundleno = 143 (0x8f), region = 64 }
  0x85   : > { %s3027_s12 = scalar_lea.vmem %s3445_s23, %s2125_s2  ;;  %s2126_s9 = sshll.u32 %s484_s1, 3 }
  0x87   : > { %s3032_s29 = scalar_lea.vmem %s3446_s27, %s2126_s9 }
  0x89   : > { %v493_v0 = vld [vmem:[%s466_s19] sm:$0xff]  ;;  %v494_v1 = vld [vmem:[%s466_s19 + $0x8] sm:$0xff]  ;;  %v495_v2 = vld [vmem:[%s466_s19 + $0x10] sm:$0xff] }
  0x8a   : > { %501 = vst [vmem:[#allocation2 + $0x30] sm:$0xff] %v493_v0  ;;  %502 = vst [vmem:[#allocation2] sm:$0xff] %v494_v1  ;;  %v496_v3 = vld [vmem:[%s466_s19 + $0x18] sm:$0xff]  ;;  %v497_v4 = vld [vmem:[%s466_s19 + $0x20] sm:$0xff] }
  0x8b   : > { %503 = vst [vmem:[#allocation2 + $0x18] sm:$0xff] %v495_v2  ;;  %v498_v5 = vld [vmem:[%s466_s19 + $0x28] sm:$0xff]  ;;  %504 = vst [vmem:[#allocation2 + $0x10] sm:$0xff] %v496_v3  ;;  %v499_v6 = vld [vmem:[%s466_s19 + $0x30] sm:$0xff] }
  0x8c   : > { %505 = vst [vmem:[#allocation2 + $0x8] sm:$0xff] %v497_v4  ;;  %506 = vst [vmem:[#allocation2 + $0x20] sm:$0xff] %v498_v5  ;;  %v500_v7 = vld [vmem:[%s466_s19 + $0x38] sm:$0xff]  ;;  %v509_v8 = vld [vmem:[%s471_s13] sm:$0xff] }
  0x8d   : > { %507 = vst [vmem:[#allocation2 + $0x28] sm:$0xff] %v499_v6  ;;  %508 = vst [vmem:[#allocation2 + $0x38] sm:$0xff] %v500_v7  ;;  %v510_v9 = vld [vmem:[%s471_s13 + $0x8] sm:$0xff] }
  0x8e   : > { %511 = vst [vmem:[#allocation3] sm:$0xff] %v509_v8  ;;  %512 = vst [vmem:[#allocation3 + $0x8] sm:$0xff] %v510_v9 }
  0x8f PF: > { %v3042_v12 = vld [vmem:[%s3032_s29 + $0x2] ss:$4 sm:$0x3]  ;;  %v3045_v13 = vld [vmem:[%s3032_s29 + $0x3] ss:$4 sm:$0x3] }
  0x90   : > { %vm577_vm0 = vcmask 261120   ;;  %v2726_v39 = vmov 0   ;;  %v2269_v40 = vld [vmem:[%s2989_s21 + $0x74] ss:$8 sps:$4 sm:$0xff]   ;;  %v2267_v44 = vld [vmem:[%s2989_s21 + $0x70] ss:$8 sps:$4 sm:$0xff]  }
  0x91   : > { %v3059_v18 = vld [vmem:[#allocation2] sm:$0xff]  ;;  %v3068_v21 = vld [vmem:[#allocation2 + $0x30] sm:$0xff]  ;;  %625 = vmatprep.mubr.bf16.mxu1 %v2726_v39  ;;  %s3447_s2 = sld [smem:[#allocation20_spill]] }
  0x92   : > { %v3061_v19 = vld [vmem:[#allocation2 + $0x10] sm:$0xff]  ;;  %v3070_v22 = vld [vmem:[#allocation2 + $0x18] sm:$0xff]  ;;  %v2275_v48 = vld [vmem:[%s2989_s21 + $0x54] ss:$8 sps:$4 sm:$0xff]  }
  0x93   : > { %v3037_v10 = vld [vmem:[#allocation2 + $0x20] sm:$0xff]  ;;  %v3051_v15 = vld [vmem:[#allocation2 + $0x8] sm:$0xff]  ;;  %v3066_v20 = vpack.c.bf16 %v3061_v19, %v3059_v18  ;;  %v3083_v25 = vpack.c.bf16 %v3070_v22, %v3068_v21  ;;  %v2272_v46 = vld [vmem:[%s2989_s21 + $0x64] ss:$8 sps:$4 sm:$0xff]  }
  0x94   : > { %v3039_v11 = vld [vmem:[#allocation2 + $0x38] sm:$0xff]  ;;  %v3053_v16 = vld [vmem:[#allocation2 + $0x28] sm:$0xff] }
  0x95   : > { %v3049_v14 = vpack.c.bf16 %v3039_v11, %v3037_v10  ;;  %v3057_v17 = vpack.c.bf16 %v3053_v16, %v3051_v15  ;;  %v3072_v23 = vld [vmem:[#allocation3 + $0x8] sm:$0xff]  ;;  %v3086_v26 = vld [vmem:[#allocation3] sm:$0xff]  ;;  %v2270_v47 = vld [vmem:[%s2989_s21 + $0x60] ss:$8 sps:$4 sm:$0xff]  }
  0x96   : > { %v535_v24 = vpack.c.bf16 %v3072_v23, %v3072_v23  ;;  %v534_v27 = vpack.c.bf16 %v3086_v26, %v3086_v26  ;;  %v2273_v49 = vld [vmem:[%s2989_s21 + $0x50] ss:$8 sps:$4 sm:$0xff]   ;;  %v2278_v50 = vld [vmem:[%s2989_s21 + $0x44] ss:$8 sps:$4 sm:$0xff]   ;;  %v2276_v51 = vld [vmem:[%s2989_s21 + $0x40] ss:$8 sps:$4 sm:$0xff]  }
  0x97   : > { %548 = vmatprep.subr.bf16.mxu0 %v3049_v14  ;;  %605 = vmatprep.subr.bf16.mxu1 %v3049_v14  ;;  %v2281_v52 = vld [vmem:[%s2989_s21 + $0x34] ss:$8 sps:$4 sm:$0xff]   ;;  %v2279_v53 = vld [vmem:[%s2989_s21 + $0x30] ss:$8 sps:$4 sm:$0xff]   ;;  %v2284_v54 = vld [vmem:[%s2989_s21 + $0x24] ss:$8 sps:$4 sm:$0xff]  }
  0x98   : > { %549 = vmatpush1.bf16.xpose.msra.mxu0 %v3057_v17  ;;  %606 = vmatpush1.bf16.msra.mxu1 %v3057_v17  ;;  %v2282_v55 = vld [vmem:[%s2989_s21 + $0x20] ss:$8 sps:$4 sm:$0xff]   ;;  %v2287_v56 = vld [vmem:[%s2989_s21 + $0x14] ss:$8 sps:$4 sm:$0xff]   ;;  %v2285_v57 = vld [vmem:[%s2989_s21 + $0x10] ss:$8 sps:$4 sm:$0xff]  }
  0x99   : > { %550 = vmatprep.subr.bf16.mxu0 %v3066_v20  ;;  %607 = vmatprep.subr.bf16.mxu1 %v3066_v20  ;;  %v2290_v58 = vld [vmem:[%s2989_s21 + $0x4] ss:$8 sps:$4 sm:$0xff]   ;;  %v2288_v59 = vld [vmem:[%s2989_s21] ss:$8 sps:$4 sm:$0xff]   ;;  %v2293_v60 = vld [vmem:[%s2989_s21 + $0xf4] ss:$8 sps:$4 sm:$0xff]  }
  0x9a   : > { %568 = vmatprep.mubr.bf16.mxu0 %v535_v24  ;;  %v2291_v61 = vld [vmem:[%s2989_s21 + $0xf0] ss:$8 sps:$4 sm:$0xff]   ;;  %v2296_v62 = vld [vmem:[%s2989_s21 + $0xe4] ss:$8 sps:$4 sm:$0xff]   ;;  %v2294_v63 = vld [vmem:[%s2989_s21 + $0xe0] ss:$8 sps:$4 sm:$0xff]  }
  0x9b   : > { %v2299_v0 = vld [vmem:[%s2989_s21 + $0xd4] ss:$8 sps:$4 sm:$0xff]   ;;  %v2297_v1 = vld [vmem:[%s2989_s21 + $0xd0] ss:$8 sps:$4 sm:$0xff]   ;;  %v2302_v2 = vld [vmem:[%s2989_s21 + $0xc4] ss:$8 sps:$4 sm:$0xff]  }
  0x9c   : > { %608 = vmatpush1.bf16.msra.mxu1 %v3083_v25  ;;  %v2300_v3 = vld [vmem:[%s2989_s21 + $0xc0] ss:$8 sps:$4 sm:$0xff]   ;;  %v2305_v4 = vld [vmem:[%s2989_s21 + $0xb4] ss:$8 sps:$4 sm:$0xff]   ;;  %v2303_v5 = vld [vmem:[%s2989_s21 + $0xb0] ss:$8 sps:$4 sm:$0xff]  }
  0x9d   : > { %873 = vmatprep.subr.bf16.mxu1 %v2269_v40  ;;  %v2308_v6 = vld [vmem:[%s2989_s21 + $0xa4] ss:$8 sps:$4 sm:$0xff]   ;;  %v2306_v7 = vld [vmem:[%s2989_s21 + $0xa0] ss:$8 sps:$4 sm:$0xff]   ;;  %v2311_v8 = vld [vmem:[%s2989_s21 + $0x94] ss:$8 sps:$4 sm:$0xff]  }
  0x9e   : > { %v2309_v9 = vld [vmem:[%s2989_s21 + $0x90] ss:$8 sps:$4 sm:$0xff]   ;;  %v2314_v24 = vld [vmem:[%s2989_s21 + $0x84] ss:$8 sps:$4 sm:$0xff]   ;;  %v2330_v39 = vld [vmem:[%s2996_s22 + $0x20] ss:$8 sps:$4 sm:$0xff]  }
  0x9f   : > { %v2335_v40 = vld [vmem:[%s2996_s22 + $0x14] ss:$8 sps:$4 sm:$0xff]   ;;  %p2049_p13 = scmp.ge.s32.totalorder %s3447_s2, 2 }
  0xa0   : > { %551 = vmatpush1.bf16.xpose.msra.mxu0 %v3083_v25 }
  0xa7   : > { %569 = vmatmul.mubr.bf16.vlgmr.msra.gmra.mxu0 %v534_v27  ;;  %v2312_v27 = vld [vmem:[%s2989_s21 + $0x80] ss:$8 sps:$4 sm:$0xff]  }
 0x167   : > { %v570_v28 = vpop.f32.mrf.mxu0 }
 0x168   : > { %v576_v29 = vmul.f32 0.0625, %v570_v28  ;;  %v2315_v28 = vld [vmem:[%s2996_s22 + $0x70] ss:$8 sps:$4 sm:$0xff]  }
 0x169   : > { %v572_v30 = vpop.f32.mrf.mxu0 }
 0x16a   : > { %v578_v31 = vsel %vm577_vm0, %v576_v29, -inf  ;;  %v2320_v30 = vld [vmem:[%s2996_s22 + $0x64] ss:$8 sps:$4 sm:$0xff]  }
 0x16b   : > { %579 = vmax.xlane.f32.xlu0 %v578_v31  ;;  %v573_v32 = vpop.f32.mrf.mxu0  ;;  %v2318_v31 = vld [vmem:[%s2996_s22 + $0x60] ss:$8 sps:$4 sm:$0xff]  }
 0x16c   : > { %v2323_v32 = vld [vmem:[%s2996_s22 + $0x54] ss:$8 sps:$4 sm:$0xff]  }
 0x16d   : > { %v574_v33 = vpop.f32.mrf.mxu0 }
 0x16e   : > { %v2321_v33 = vld [vmem:[%s2996_s22 + $0x50] ss:$8 sps:$4 sm:$0xff]  }
 0x1f4   : > { %v580_v34 = vpop.xlane.xlu0 %579 }
 0x1f5   : > { %v581_v35 = vsub.f32 %v576_v29, %v580_v34  ;;  %v2317_v29 = vld [vmem:[%s2996_s22 + $0x74] ss:$8 sps:$4 sm:$0xff]   ;;  %v2326_v34 = vld [vmem:[%s2996_s22 + $0x44] ss:$8 sps:$4 sm:$0xff]  }
 0x1f6   : > { %1105 = vmatprep.subr.bf16.mxu0 %v2317_v29 }
 0x1f7   : > { %v582_v36 = vmul.f32 1.442695, %v581_v35  ;;  %1106 = vmatpush1.bf16.msra.mxu0 %v2315_v28  ;;  %v2324_v35 = vld [vmem:[%s2996_s22 + $0x40] ss:$8 sps:$4 sm:$0xff]  }
 0x1f8   : > { %1107 = vmatprep.subr.bf16.mxu0 %v2320_v30 }
 0x1f9   : > { %2363 = vpow2.f32 %v582_v36  ;;  %v2329_v36 = vld [vmem:[%s2996_s22 + $0x34] ss:$8 sps:$4 sm:$0xff]  }
 0x1fb   : > { %1108 = vmatpush1.bf16.msra.mxu0 %v2318_v31 }
 0x1fc   : > { %1109 = vmatprep.subr.bf16.mxu0 %v2323_v32 }
 0x1ff   : > { %1110 = vmatpush1.bf16.msra.mxu0 %v2321_v33 }
 0x200   : > { %1111 = vmatprep.subr.bf16.mxu0 %v2326_v34 }
 0x203   : > { %1112 = vmatpush1.bf16.msra.mxu0 %v2324_v35 }
 0x204   : > { %1113 = vmatprep.subr.bf16.mxu0 %v2329_v36 }
 0x206   : > { %v2364_v37 = vpop.eup %2363 }
 0x207   : > { %v584_v38 = vsel %vm577_vm0, %v2364_v37, 0.0 }
 0x208   : > { %585 = vadd.xlane.f32.xlu0 %v584_v38  ;;  %v2332_v38 = vld [vmem:[%s2996_s22 + $0x24] ss:$8 sps:$4 sm:$0xff]  }
 0x291   : > { %v586_v41 = vpop.xlane.xlu0 %585 }
 0x292   : > { %2365 = vrcp.f32 %v586_v41  ;;  %v2333_v41 = vld [vmem:[%s2996_s22 + $0x10] ss:$8 sps:$4 sm:$0xff]  }
 0x29f   : > { %v2366_v42 = vpop.eup %2365 }
 0x2a0   : > { %v588_v43 = vmul.f32 %v2366_v42, %v2364_v37  ;;  %v2327_v37 = vld [vmem:[%s2996_s22 + $0x30] ss:$8 sps:$4 sm:$0xff]  }
 0x2a1   : > { %1114 = vmatpush1.bf16.msra.mxu0 %v2327_v37 }
 0x2a2   : > { %v589_v45 = vpack.c.bf16 %v588_v43, %v588_v43  ;;  %1115 = vmatprep.subr.bf16.mxu0 %v2332_v38 }
 0x2a4   : > { %1984 = vmatmul.mubr.msk.bf16.vlgmr.msra.gmra.mxu1 %vm577_vm0, %v589_v45 }
 0x2a5   : > { %874 = vmatpush1.bf16.msra.mxu1 %v2267_v44  ;;  %1116 = vmatpush1.bf16.msra.mxu0 %v2330_v39 }
 0x2a6   : > { %875 = vmatprep.subr.bf16.mxu1 %v2272_v46  ;;  %1117 = vmatprep.subr.bf16.mxu0 %v2335_v40 }
 0x2a9   : > { %876 = vmatpush1.bf16.msra.mxu1 %v2270_v47  ;;  %1118 = vmatpush1.bf16.msra.mxu0 %v2333_v41 }
 0x2aa   : > { %877 = vmatprep.subr.bf16.mxu1 %v2275_v48 }
 0x2ad   : > { %878 = vmatpush1.bf16.msra.mxu1 %v2273_v49 }
 0x2ae   : > { %879 = vmatprep.subr.bf16.mxu1 %v2278_v50  ;;  %v2336_v50 = vld [vmem:[%s2996_s22] ss:$8 sps:$4 sm:$0xff]  }
 0x2b1   : > { %880 = vmatpush1.bf16.msra.mxu1 %v2276_v51  ;;  %v2339_v51 = vld [vmem:[%s2996_s22 + $0xf0] ss:$8 sps:$4 sm:$0xff]  }
 0x2b2   : > { %881 = vmatprep.subr.bf16.mxu1 %v2281_v52  ;;  %v2344_v52 = vld [vmem:[%s2996_s22 + $0xe4] ss:$8 sps:$4 sm:$0xff]  }
 0x2b5   : > { %882 = vmatpush1.bf16.msra.mxu1 %v2279_v53  ;;  %v2342_v53 = vld [vmem:[%s2996_s22 + $0xe0] ss:$8 sps:$4 sm:$0xff]  }
 0x2b6   : > { %883 = vmatprep.subr.bf16.mxu1 %v2284_v54  ;;  %v2347_v54 = vld [vmem:[%s2996_s22 + $0xd4] ss:$8 sps:$4 sm:$0xff]  }
 0x2b9   : > { %884 = vmatpush1.bf16.msra.mxu1 %v2282_v55  ;;  %v2345_v55 = vld [vmem:[%s2996_s22 + $0xd0] ss:$8 sps:$4 sm:$0xff]  }
 0x2ba   : > { %885 = vmatprep.subr.bf16.mxu1 %v2287_v56  ;;  %v2350_v56 = vld [vmem:[%s2996_s22 + $0xc4] ss:$8 sps:$4 sm:$0xff]  }
 0x2bd   : > { %886 = vmatpush1.bf16.msra.mxu1 %v2285_v57  ;;  %v2348_v57 = vld [vmem:[%s2996_s22 + $0xc0] ss:$8 sps:$4 sm:$0xff]  }
 0x2be   : > { %887 = vmatprep.subr.bf16.mxu1 %v2290_v58  ;;  %v2353_v58 = vld [vmem:[%s2996_s22 + $0xb4] ss:$8 sps:$4 sm:$0xff]  }
 0x2c1   : > { %888 = vmatpush1.bf16.msra.mxu1 %v2288_v59  ;;  %v2351_v59 = vld [vmem:[%s2996_s22 + $0xb0] ss:$8 sps:$4 sm:$0xff]  }
 0x2c2   : > { %889 = vmatprep.subr.bf16.mxu1 %v2293_v60  ;;  %v2356_v60 = vld [vmem:[%s2996_s22 + $0xa4] ss:$8 sps:$4 sm:$0xff]  }
 0x2c5   : > { %890 = vmatpush2.bf16.msra.mxu1 %v2291_v61  ;;  %v2354_v61 = vld [vmem:[%s2996_s22 + $0xa0] ss:$8 sps:$4 sm:$0xff]  }
 0x2c6   : > { %891 = vmatprep.subr.bf16.mxu1 %v2296_v62  ;;  %v2359_v62 = vld [vmem:[%s2996_s22 + $0x94] ss:$8 sps:$4 sm:$0xff]  }
 0x2c9   : > { %892 = vmatpush2.bf16.msra.mxu1 %v2294_v63  ;;  %v2357_v63 = vld [vmem:[%s2996_s22 + $0x90] ss:$8 sps:$4 sm:$0xff]  }
 0x2ca   : > { %893 = vmatprep.subr.bf16.mxu1 %v2299_v0  ;;  %v2362_v0 = vld [vmem:[%s2996_s22 + $0x84] ss:$8 sps:$4 sm:$0xff]  }
 0x2cd   : > { %894 = vmatpush2.bf16.msra.mxu1 %v2297_v1  ;;  %v2360_v1 = vld [vmem:[%s2996_s22 + $0x80] ss:$8 sps:$4 sm:$0xff]  }
 0x2ce   : > { %895 = vmatprep.subr.bf16.mxu1 %v2302_v2  ;;  %v703_v2 = vlaneseq }
 0x2d1   : > { %896 = vmatpush2.bf16.msra.mxu1 %v2300_v3  ;;  %v704_v3 = vshrl.u32 %v703_v2, 7 }
 0x2d2   : > { %897 = vmatprep.subr.bf16.mxu1 %v2305_v4 }
 0x2d3   : > { %v3168_v4 = vsub.s32 0, %v704_v3 }
 0x2d5   : > { %898 = vmatpush2.bf16.msra.mxu1 %v2303_v5  ;;  %v523_v5 = vld [vmem:[%s3032_s29] ss:$4 sm:$0x3] }
 0x2d6   : > { %899 = vmatprep.subr.bf16.mxu1 %v2308_v6  ;;  %v3171_v6 = vsub.s32 1, %v704_v3 }
 0x2d9   : > { %900 = vmatpush2.bf16.msra.mxu1 %v2306_v7  ;;  %v706_v7 = vrot.slane %v523_v5, %v3168_v4 }
 0x2da   : > { %901 = vmatprep.subr.bf16.mxu1 %v2311_v8  ;;  %v710_v8 = vrot.slane %v523_v5, %v3171_v6 }
 0x2dd   : > { %902 = vmatpush2.bf16.msra.mxu1 %v2309_v9 }
 0x2de   : > { %903 = vmatprep.subr.bf16.mxu1 %v2314_v24 }
 0x2e1   : > { %904 = vmatpush2.bf16.msra.mxu1 %v2312_v27 }
 0x364   : > { %v627_v42 = vpop.f32.mrf.mxu1 }
 0x365   : > { %v3141_v43 = vadd.f32 %v627_v42, %v3086_v26  ;;  %v2338_v26 = vld [vmem:[%s2996_s22 + $0x4] ss:$8 sps:$4 sm:$0xff]  }
 0x366   : > { %v629_v44 = vpop.f32.mrf.mxu1  ;;  %1119 = vmatprep.subr.bf16.mxu0 %v2338_v26 }
 0x367   : > { %v3144_v45 = vadd.f32 %v629_v44, %v3072_v23  ;;  %v700_v48 = vpack.c.bf16 %v3141_v43, %v3141_v43  ;;  %1120 = vmatpush1.bf16.msra.mxu0 %v2336_v50  ;;  %v2341_v23 = vld [vmem:[%s2996_s22 + $0xf4] ss:$8 sps:$4 sm:$0xff]  }
 0x368   : > { %v631_v46 = vpop.f32.mrf.mxu1  ;;  %1121 = vmatprep.subr.bf16.mxu0 %v2341_v23 }
 0x369   : > { %v701_v47 = vpack.c.bf16 %v3144_v45, %v3144_v45 }
 0x36a   : > { %v632_v49 = vpop.f32.mrf.mxu1 }
 0x36b   : > { %905 = vmatprep.mubr.bf16.mxu1 %v701_v47  ;;  %1122 = vmatpush2.bf16.msra.mxu0 %v2339_v51  ;;  %v1981_v51 = vld [vmem:[%s3032_s29 + $0x1] ss:$4 sm:$0x3] }
 0x36c   : > { %906 = vmatmul.mubr.bf16.vlgmr.msra.gmra.mxu1 %v700_v48  ;;  %1123 = vmatprep.subr.bf16.mxu0 %v2344_v52  ;;  %v938_v52 = vrot.slane %v1981_v51, %v3168_v4 }
 0x36f   : > { %1124 = vmatpush2.bf16.msra.mxu0 %v2342_v53  ;;  %v942_v53 = vrot.slane %v1981_v51, %v3171_v6 }
 0x370   : > { %1125 = vmatprep.subr.bf16.mxu0 %v2347_v54 }
 0x373   : > { %1126 = vmatpush2.bf16.msra.mxu0 %v2345_v55 }
 0x374   : > { %1127 = vmatprep.subr.bf16.mxu0 %v2350_v56 }
 0x377   : > { %1128 = vmatpush2.bf16.msra.mxu0 %v2348_v57 }
 0x378   : > { %1129 = vmatprep.subr.bf16.mxu0 %v2353_v58 }
 0x37b   : > { %1130 = vmatpush2.bf16.msra.mxu0 %v2351_v59 }
 0x37c   : > { %1131 = vmatprep.subr.bf16.mxu0 %v2356_v60 }
 0x37f   : > { %1132 = vmatpush2.bf16.msra.mxu0 %v2354_v61 }
 0x380   : > { %1133 = vmatprep.subr.bf16.mxu0 %v2359_v62 }
 0x383   : > { %1134 = vmatpush2.bf16.msra.mxu0 %v2357_v63 }
 0x384   : > { %1135 = vmatprep.subr.bf16.mxu0 %v2362_v0 }
 0x387   : > { %1136 = vmatpush2.bf16.msra.mxu0 %v2360_v1 }
 0x42c   : > { %v907_v9 = vpop.f32.mrf.mxu1 }
 0x42d   : > { %v908_v24 = vadd.f32 %v907_v9, %v706_v7 }
 0x42e   : > { %v909_v27 = vpop.f32.mrf.mxu1 }
 0x42f   : > { %v916_v28 = vmul.f32 0.044715, %v908_v24  ;;  %v910_v29 = vadd.f32 %v909_v27, %v710_v8  ;;  %v914_v46 = vmul.f32 0.5, %v908_v24 }
 0x430   : > { %v911_v30 = vpop.f32.mrf.mxu1 }
 0x431   : > { %v918_v31 = vmul.f32 %v916_v28, %v908_v24  ;;  %v917_v32 = vmul.f32 0.044715, %v910_v29  ;;  %v915_v47 = vmul.f32 0.5, %v910_v29 }
 0x432   : > { %v912_v33 = vpop.f32.mrf.mxu1 }
 0x433   : > { %v920_v34 = vmul.f32 %v918_v31, %v908_v24  ;;  %v919_v35 = vmul.f32 %v917_v32, %v910_v29 }
 0x435   : > { %v922_v36 = vadd.f32 %v920_v34, %v908_v24  ;;  %v921_v37 = vmul.f32 %v919_v35, %v910_v29 }
 0x437   : > { %v924_v38 = vmul.f32 0.7978846, %v922_v36  ;;  %v923_v39 = vadd.f32 %v921_v37, %v910_v29 }
 0x439   : > { %v925_v40 = vmul.f32 0.7978846, %v923_v39  ;;  %2367 = vtanh.f32 %v924_v38 }
 0x43b   : > { %2369 = vtanh.f32 %v925_v40 }
 0x446   : > { %v2368_v41 = vpop.eup %2367 }
 0x447   : > { %v928_v42 = vadd.f32 1.0, %v2368_v41 }
 0x448   : > { %v2370_v44 = vpop.eup %2369 }
 0x449   : > { %v929_v48 = vadd.f32 1.0, %v2370_v44  ;;  %v930_v49 = vmul.f32 %v928_v42, %v914_v46 }
 0x44b   : > { %v931_v26 = vmul.f32 %v929_v48, %v915_v47  ;;  %v932_v23 = vpack.c.bf16 %v930_v49, %v930_v49 }
 0x44d   : > { %v933_v50 = vpack.c.bf16 %v931_v26, %v931_v26 }
 0x44f   : > { %1137 = vmatprep.mubr.bf16.mxu0 %v933_v50 }
 0x450   : > { %1138 = vmatmul.mubr.bf16.vlgmr.msra.gmra.mxu0 %v932_v23 }
 0x510   : > { %v1139_v54 = vpop.f32.mrf.mxu0 }
 0x511   : > { %v1140_v55 = vadd.f32 %v1139_v54, %v938_v52 }
 0x512   : > { %v1141_v56 = vpop.f32.mrf.mxu0 }
 0x513   : > { %v3179_v57 = vadd.f32 %v1140_v55, %v3141_v43  ;;  %v1142_v58 = vadd.f32 %v1141_v56, %v942_v53  ;;  %1153 = sbr.rel (%p2049_p13) target bundleno = 1814 (0x716), region = 68 }
 0x514   : > { %v1143_v59 = vpop.f32.mrf.mxu0 }
 0x515   : > { %1148 = vst [vmem:[#allocation3] sm:$0xff] %v3179_v57  ;;  %v3183_v60 = vadd.f32 %v1142_v58, %v3144_v45 }
 0x516   : > { %v1144_v61 = vpop.f32.mrf.mxu0 }
 0x517   : > { %1149 = vst [vmem:[#allocation3 + $0x8] sm:$0xff] %v3183_v60 }
 0x518   : > { %v2371_v43 = vld [vmem:[%s3027_s12 + $0x74] ss:$8 sps:$4 sm:$0xff]   ;;  %1421 = vmatprep.mubr.bf16.mxu0 %v3066_v20  ;;  %v2373_v45 = vld [vmem:[%s3027_s12 + $0x70] ss:$8 sps:$4 sm:$0xff]   ;;  %v2374_v62 = vld [vmem:[%s3027_s12 + $0x64] ss:$8 sps:$4 sm:$0xff]  }
 0x519   : > { %1389 = vmatprep.subr.bf16.mxu0 %v2371_v43  ;;  %v2376_v63 = vld [vmem:[%s3027_s12 + $0x60] ss:$8 sps:$4 sm:$0xff]   ;;  %v2377_v0 = vld [vmem:[%s3027_s12 + $0x54] ss:$8 sps:$4 sm:$0xff]   ;;  %v2379_v1 = vld [vmem:[%s3027_s12 + $0x50] ss:$8 sps:$4 sm:$0xff]  }
 0x51a   : > { %1390 = vmatpush1.bf16.msra.mxu0 %v2373_v45  ;;  %v2380_v2 = vld [vmem:[%s3027_s12 + $0x44] ss:$8 sps:$4 sm:$0xff]   ;;  %v2382_v20 = vld [vmem:[%s3027_s12 + $0x40] ss:$8 sps:$4 sm:$0xff]   ;;  %v2383_v3 = vld [vmem:[%s3027_s12 + $0x34] ss:$8 sps:$4 sm:$0xff]  }
 0x51b   : > { %1391 = vmatprep.subr.bf16.mxu0 %v2374_v62  ;;  %v2385_v5 = vld [vmem:[%s3027_s12 + $0x30] ss:$8 sps:$4 sm:$0xff]   ;;  %v2386_v7 = vld [vmem:[%s3027_s12 + $0x24] ss:$8 sps:$4 sm:$0xff]   ;;  %v2388_v8 = vld [vmem:[%s3027_s12 + $0x20] ss:$8 sps:$4 sm:$0xff]  }
 0x51c   : > { %v2389_v9 = vld [vmem:[%s3027_s12 + $0x14] ss:$8 sps:$4 sm:$0xff]   ;;  %v2419_v24 = vld [vmem:[%s3003_s18 + $0x74] ss:$8 sps:$4 sm:$0xff]   ;;  %v2421_v27 = vld [vmem:[%s3003_s18 + $0x70] ss:$8 sps:$4 sm:$0xff]  }
 0x51d   : > { %v2391_v28 = vld [vmem:[%s3027_s12 + $0x10] ss:$8 sps:$4 sm:$0xff]   ;;  %v2422_v29 = vld [vmem:[%s3003_s18 + $0x64] ss:$8 sps:$4 sm:$0xff]   ;;  %v2392_v30 = vld [vmem:[%s3027_s12 + $0x4] ss:$8 sps:$4 sm:$0xff]   ;;  %1689 = vmatprep.subr.bf16.mxu1 %v2419_v24 }
 0x51e   : > { %1392 = vmatpush1.bf16.msra.mxu0 %v2376_v63  ;;  %1690 = vmatpush1.bf16.msra.mxu1 %v2421_v27  ;;  %v2424_v31 = vld [vmem:[%s3003_s18 + $0x60] ss:$8 sps:$4 sm:$0xff]   ;;  %v2425_v32 = vld [vmem:[%s3003_s18 + $0x54] ss:$8 sps:$4 sm:$0xff]   ;;  %v2394_v33 = vld [vmem:[%s3027_s12] ss:$8 sps:$4 sm:$0xff]   ;;  %v1222_v27 = vrot.slane %v3042_v12, %v3168_v4 }
 0x51f   : > { %1393 = vmatprep.subr.bf16.mxu0 %v2377_v0  ;;  %1691 = vmatprep.subr.bf16.mxu1 %v2422_v29  ;;  %v2395_v34 = vld [vmem:[%s3027_s12 + $0xf4] ss:$8 sps:$4 sm:$0xff]   ;;  %v2427_v35 = vld [vmem:[%s3003_s18 + $0x50] ss:$8 sps:$4 sm:$0xff]   ;;  %v2397_v36 = vld [vmem:[%s3027_s12 + $0xf0] ss:$8 sps:$4 sm:$0xff]  }
 0x520   : > { %v2428_v37 = vld [vmem:[%s3003_s18 + $0x44] ss:$8 sps:$4 sm:$0xff]   ;;  %v2398_v38 = vld [vmem:[%s3027_s12 + $0xe4] ss:$8 sps:$4 sm:$0xff]   ;;  %v2430_v39 = vld [vmem:[%s3003_s18 + $0x40] ss:$8 sps:$4 sm:$0xff]  }
 0x521   : > { %v2431_v40 = vld [vmem:[%s3003_s18 + $0x34] ss:$8 sps:$4 sm:$0xff]   ;;  %v2400_v41 = vld [vmem:[%s3027_s12 + $0xe0] ss:$8 sps:$4 sm:$0xff]   ;;  %v2401_v42 = vld [vmem:[%s3027_s12 + $0xd4] ss:$8 sps:$4 sm:$0xff]  }
 0x522   : > { %1394 = vmatpush1.bf16.msra.mxu0 %v2379_v1  ;;  %1692 = vmatpush1.bf16.msra.mxu1 %v2424_v31  ;;  %v2433_v44 = vld [vmem:[%s3003_s18 + $0x30] ss:$8 sps:$4 sm:$0xff]   ;;  %v2434_v46 = vld [vmem:[%s3003_s18 + $0x24] ss:$8 sps:$4 sm:$0xff]   ;;  %v2403_v47 = vld [vmem:[%s3027_s12 + $0xd0] ss:$8 sps:$4 sm:$0xff]  }
 0x523   : > { %1395 = vmatprep.subr.bf16.mxu0 %v2380_v2  ;;  %1693 = vmatprep.subr.bf16.mxu1 %v2425_v32  ;;  %v2404_v48 = vld [vmem:[%s3027_s12 + $0xc4] ss:$8 sps:$4 sm:$0xff]   ;;  %v2436_v49 = vld [vmem:[%s3003_s18 + $0x20] ss:$8 sps:$4 sm:$0xff]   ;;  %v2406_v26 = vld [vmem:[%s3027_s12 + $0xc0] ss:$8 sps:$4 sm:$0xff]  }
 0x524   : > { %v2407_v50 = vld [vmem:[%s3027_s12 + $0xb4] ss:$8 sps:$4 sm:$0xff]   ;;  %v2409_v23 = vld [vmem:[%s3027_s12 + $0xb0] ss:$8 sps:$4 sm:$0xff]   ;;  %v2410_v51 = vld [vmem:[%s3027_s12 + $0xa4] ss:$8 sps:$4 sm:$0xff]  }
 0x525   : > { %v2412_v52 = vld [vmem:[%s3027_s12 + $0xa0] ss:$8 sps:$4 sm:$0xff]   ;;  %v2413_v53 = vld [vmem:[%s3027_s12 + $0x94] ss:$8 sps:$4 sm:$0xff]   ;;  %v2415_v54 = vld [vmem:[%s3027_s12 + $0x90] ss:$8 sps:$4 sm:$0xff]  }
 0x526   : > { %1396 = vmatpush1.bf16.msra.mxu0 %v2382_v20  ;;  %1694 = vmatpush1.bf16.msra.mxu1 %v2427_v35  ;;  %v2416_v55 = vld [vmem:[%s3027_s12 + $0x84] ss:$8 sps:$4 sm:$0xff]   ;;  %v2418_v56 = vld [vmem:[%s3027_s12 + $0x80] ss:$8 sps:$4 sm:$0xff]   ;;  %v2440_v61 = vld [vmem:[%s3003_s18 + $0x4] ss:$8 sps:$4 sm:$0xff]  }
 0x527   : > { %1397 = vmatprep.subr.bf16.mxu0 %v2383_v3  ;;  %1695 = vmatprep.subr.bf16.mxu1 %v2428_v37  ;;  %v2437_v58 = vld [vmem:[%s3003_s18 + $0x14] ss:$8 sps:$4 sm:$0xff]   ;;  %v2439_v59 = vld [vmem:[%s3003_s18 + $0x10] ss:$8 sps:$4 sm:$0xff]   ;;  %v2442_v43 = vld [vmem:[%s3003_s18] ss:$8 sps:$4 sm:$0xff]  }
 0x528   : > { %v2443_v45 = vld [vmem:[%s3003_s18 + $0xf4] ss:$8 sps:$4 sm:$0xff]   ;;  %v2451_v63 = vld [vmem:[%s3003_s18 + $0xd0] ss:$8 sps:$4 sm:$0xff]   ;;  %v2452_v0 = vld [vmem:[%s3003_s18 + $0xc4] ss:$8 sps:$4 sm:$0xff]  }
 0x529   : > { %v2449_v62 = vld [vmem:[%s3003_s18 + $0xd4] ss:$8 sps:$4 sm:$0xff]   ;;  %v2454_v1 = vld [vmem:[%s3003_s18 + $0xc0] ss:$8 sps:$4 sm:$0xff]   ;;  %v2457_v20 = vld [vmem:[%s3003_s18 + $0xb0] ss:$8 sps:$4 sm:$0xff]  }
 0x52a   : > { %1398 = vmatpush1.bf16.msra.mxu0 %v2385_v5  ;;  %1696 = vmatpush1.bf16.msra.mxu1 %v2430_v39  ;;  %v2455_v2 = vld [vmem:[%s3003_s18 + $0xb4] ss:$8 sps:$4 sm:$0xff]   ;;  %v2458_v3 = vld [vmem:[%s3003_s18 + $0xa4] ss:$8 sps:$4 sm:$0xff]   ;;  %v2460_v5 = vld [vmem:[%s3003_s18 + $0xa0] ss:$8 sps:$4 sm:$0xff]  }
 0x52b   : > { %1399 = vmatprep.subr.bf16.mxu0 %v2386_v7  ;;  %1697 = vmatprep.subr.bf16.mxu1 %v2431_v40  ;;  %v2461_v7 = vld [vmem:[%s3003_s18 + $0x94] ss:$8 sps:$4 sm:$0xff]   ;;  %v2466_v24 = vld [vmem:[%s3003_s18 + $0x80] ss:$8 sps:$4 sm:$0xff]  }
 0x52e   : > { %1400 = vmatpush1.bf16.msra.mxu0 %v2388_v8  ;;  %1698 = vmatpush1.bf16.msra.mxu1 %v2433_v44  ;;  %v2463_v8 = vld [vmem:[%s3003_s18 + $0x90] ss:$8 sps:$4 sm:$0xff]  }
 0x52f   : > { %1401 = vmatprep.subr.bf16.mxu0 %v2389_v9  ;;  %1699 = vmatprep.subr.bf16.mxu1 %v2434_v46  ;;  %v2464_v9 = vld [vmem:[%s3003_s18 + $0x84] ss:$8 sps:$4 sm:$0xff]  }
 0x532   : > { %1402 = vmatpush1.bf16.msra.mxu0 %v2391_v28  ;;  %1700 = vmatpush1.bf16.msra.mxu1 %v2436_v49  ;;  %v1226_v28 = vrot.slane %v3042_v12, %v3171_v6 }
 0x533   : > { %1403 = vmatprep.subr.bf16.mxu0 %v2392_v30  ;;  %1701 = vmatprep.subr.bf16.mxu1 %v2437_v58 }
 0x536   : > { %1404 = vmatpush1.bf16.msra.mxu0 %v2394_v33  ;;  %1702 = vmatpush1.bf16.msra.mxu1 %v2439_v59 }
 0x537   : > { %1405 = vmatprep.subr.bf16.mxu0 %v2395_v34  ;;  %1703 = vmatprep.subr.bf16.mxu1 %v2440_v61 }
 0x53a   : > { %1406 = vmatpush2.bf16.msra.mxu0 %v2397_v36  ;;  %1704 = vmatpush1.bf16.msra.mxu1 %v2442_v43 }
 0x53b   : > { %1407 = vmatprep.subr.bf16.mxu0 %v2398_v38  ;;  %1705 = vmatprep.subr.bf16.mxu1 %v2443_v45 }
 0x53e   : > { %1408 = vmatpush2.bf16.msra.mxu0 %v2400_v41 }
 0x53f   : > { %1409 = vmatprep.subr.bf16.mxu0 %v2401_v42 }
 0x542   : > { %1410 = vmatpush2.bf16.msra.mxu0 %v2403_v47 }
 0x543   : > { %1411 = vmatprep.subr.bf16.mxu0 %v2404_v48 }
 0x546   : > { %1412 = vmatpush2.bf16.msra.mxu0 %v2406_v26 }
 0x547   : > { %1413 = vmatprep.subr.bf16.mxu0 %v2407_v50 }
 0x54a   : > { %1414 = vmatpush2.bf16.msra.mxu0 %v2409_v23 }
 0x54b   : > { %1415 = vmatprep.subr.bf16.mxu0 %v2410_v51 }
 0x54e   : > { %1416 = vmatpush2.bf16.msra.mxu0 %v2412_v52 }
 0x54f   : > { %1417 = vmatprep.subr.bf16.mxu0 %v2413_v53 }
 0x552   : > { %1418 = vmatpush2.bf16.msra.mxu0 %v2415_v54 }
 0x553   : > { %1419 = vmatprep.subr.bf16.mxu0 %v2416_v55 }
 0x556   : > { %1420 = vmatpush2.bf16.msra.mxu0 %v2418_v56 }
 0x559   : > { %1422 = vmatmul.mubr.bf16.vlgmr.msra.gmra.mxu0 %v3083_v25  ;;  %v2445_v25 = vld [vmem:[%s3003_s18 + $0xf0] ss:$8 sps:$4 sm:$0xff]  }
 0x55a   : > { %1431 = vmatprep.mubr.bf16.mxu0 %v3049_v14  ;;  %1706 = vmatpush2.bf16.msra.mxu1 %v2445_v25  ;;  %v2446_v14 = vld [vmem:[%s3003_s18 + $0xe4] ss:$8 sps:$4 sm:$0xff]  }
 0x55b   : > { %1707 = vmatprep.subr.bf16.mxu1 %v2446_v14 }
 0x561   : > { %1432 = vmatmul.mubr.bf16.gmra.mxu0 %v3057_v17  ;;  %v2448_v17 = vld [vmem:[%s3003_s18 + $0xe0] ss:$8 sps:$4 sm:$0xff]  }
 0x562   : > { %1708 = vmatpush2.bf16.msra.mxu1 %v2448_v17 }
 0x563   : > { %1709 = vmatprep.subr.bf16.mxu1 %v2449_v62 }
 0x566   : > { %1710 = vmatpush2.bf16.msra.mxu1 %v2451_v63 }
 0x567   : > { %1711 = vmatprep.subr.bf16.mxu1 %v2452_v0 }
 0x56a   : > { %1712 = vmatpush2.bf16.msra.mxu1 %v2454_v1 }
 0x56b   : > { %1713 = vmatprep.subr.bf16.mxu1 %v2455_v2 }
 0x56e   : > { %1714 = vmatpush2.bf16.msra.mxu1 %v2457_v20 }
 0x56f   : > { %1715 = vmatprep.subr.bf16.mxu1 %v2458_v3 }
 0x572   : > { %1716 = vmatpush2.bf16.msra.mxu1 %v2460_v5 }
 0x573   : > { %1717 = vmatprep.subr.bf16.mxu1 %v2461_v7 }
 0x576   : > { %1718 = vmatpush2.bf16.msra.mxu1 %v2463_v8 }
 0x577   : > { %1719 = vmatprep.subr.bf16.mxu1 %v2464_v9 }
 0x57a   : > { %1720 = vmatpush2.bf16.msra.mxu1 %v2466_v24 }
 0x619   : > { %v1423_v29 = vpop.f32.mrf.mxu0 }
 0x61a   : > { %v3259_v30 = vadd.f32 %v1423_v29, %v1222_v27 }
 0x61b   : > { %v1425_v31 = vpop.f32.mrf.mxu0 }
 0x61c   : > { %v1450_v32 = vmul.f32 0.044715, %v3259_v30  ;;  %v3262_v33 = vadd.f32 %v1425_v31, %v1226_v28 }
 0x61d   : > { %v1427_v34 = vpop.f32.mrf.mxu0 }
 0x61e   : > { %v1458_v35 = vmul.f32 %v1450_v32, %v3259_v30  ;;  %v1451_v36 = vmul.f32 0.044715, %v3262_v33  ;;  %v1428_v37 = vadd.f32 %v1427_v34, %v1222_v27 }
 0x61f   : > { %v1429_v38 = vpop.f32.mrf.mxu0 }
 0x620   : > { %v1466_v39 = vmul.f32 %v1458_v35, %v3259_v30  ;;  %v1452_v40 = vmul.f32 0.044715, %v1428_v37  ;;  %v1430_v41 = vadd.f32 %v1429_v38, %v1226_v28  ;;  %v1459_v12 = vmul.f32 %v1451_v36, %v3262_v33 }
 0x621   : > { %v1433_v42 = vpop.f32.mrf.mxu0 }
 0x622   : > { %v1460_v44 = vmul.f32 %v1452_v40, %v1428_v37  ;;  %v1453_v46 = vmul.f32 0.044715, %v1430_v41  ;;  %v3268_v47 = vadd.f32 %v1433_v42, %v1222_v27  ;;  %v1467_v49 = vmul.f32 %v1459_v12, %v3262_v33 }
 0x623   : > { %v1435_v48 = vpop.f32.mrf.mxu0  ;;  %v1474_v26 = vadd.f32 %v1466_v39, %v3259_v30 }
 0x624   : > { %v1468_v50 = vmul.f32 %v1460_v44, %v1428_v37  ;;  %v1454_v23 = vmul.f32 0.044715, %v3268_v47  ;;  %v3273_v51 = vadd.f32 %v1435_v48, %v1226_v28  ;;  %v1461_v52 = vmul.f32 %v1453_v46, %v1430_v41 }
 0x625   : > { %v1437_v53 = vpop.f32.mrf.mxu0  ;;  %v1475_v54 = vadd.f32 %v1467_v49, %v3262_v33  ;;  %v1482_v55 = vmul.f32 0.7978846, %v1474_v26  ;;  %v1444_v44 = vmul.f32 0.5, %v1428_v37  ;;  %v1443_v48 = vmul.f32 0.5, %v3262_v33 }
 0x626   : > { %v1462_v56 = vmul.f32 %v1454_v23, %v3268_v47  ;;  %v1455_v58 = vmul.f32 0.044715, %v3273_v51  ;;  %v1438_v59 = vadd.f32 %v1437_v53, %v1222_v27  ;;  %v1469_v61 = vmul.f32 %v1461_v52, %v1430_v41 }
 0x627   : > { %v1439_v43 = vpop.f32.mrf.mxu0  ;;  %v1483_v45 = vmul.f32 0.7978846, %v1475_v54  ;;  %v1476_v25 = vadd.f32 %v1468_v50, %v1428_v37  ;;  %v1445_v49 = vmul.f32 0.5, %v1430_v41  ;;  %v1442_v50 = vmul.f32 0.5, %v3259_v30 }
 0x628   : > { %v1470_v14 = vmul.f32 %v1462_v56, %v3268_v47  ;;  %v1463_v17 = vmul.f32 %v1455_v58, %v3273_v51  ;;  %v1456_v62 = vmul.f32 0.044715, %v1438_v59  ;;  %v1440_v63 = vadd.f32 %v1439_v43, %v1226_v28 }
 0x629   : > { %v1477_v0 = vadd.f32 %v1469_v61, %v1430_v41  ;;  %2467 = vtanh.f32 %v1483_v45  ;;  %v1484_v1 = vmul.f32 0.7978846, %v1476_v25  ;;  %v1447_v37 = vmul.f32 0.5, %v3273_v51 }
 0x62a   : > { %v1471_v2 = vmul.f32 %v1463_v17, %v3273_v51  ;;  %v1464_v20 = vmul.f32 %v1456_v62, %v1438_v59  ;;  %v1457_v3 = vmul.f32 0.044715, %v1440_v63  ;;  %2469 = vtanh.f32 %v1482_v55 }
 0x62b   : > { %v1485_v5 = vmul.f32 0.7978846, %v1477_v0  ;;  %2471 = vtanh.f32 %v1484_v1  ;;  %v1478_v7 = vadd.f32 %v1470_v14, %v3268_v47  ;;  %v1449_v33 = vmul.f32 0.5, %v1440_v63 }
 0x62c   : > { %v1472_v8 = vmul.f32 %v1464_v20, %v1438_v59  ;;  %v1465_v9 = vmul.f32 %v1457_v3, %v1440_v63  ;;  %v1479_v24 = vadd.f32 %v1471_v2, %v3273_v51  ;;  %v1448_v17 = vmul.f32 0.5, %v1438_v59 }
 0x62d   : > { %2473 = vtanh.f32 %v1485_v5  ;;  %v1486_v27 = vmul.f32 0.7978846, %v1478_v7  ;;  %v1446_v1 = vmul.f32 0.5, %v3268_v47  ;;  %v1522_v7 = vrot.slane %v3045_v13, %v3168_v4 }
 0x62e   : > { %v1473_v29 = vmul.f32 %v1465_v9, %v1440_v63  ;;  %v1487_v28 = vmul.f32 0.7978846, %v1479_v24  ;;  %v1480_v31 = vadd.f32 %v1472_v8, %v1438_v59  ;;  %v1526_v51 = vrot.slane %v3045_v13, %v3171_v6 }
 0x630   : > { %v1481_v32 = vadd.f32 %v1473_v29, %v1440_v63  ;;  %2475 = vtanh.f32 %v1487_v28  ;;  %v1488_v34 = vmul.f32 0.7978846, %v1480_v31 }
 0x631   : > { %2477 = vtanh.f32 %v1486_v27 }
 0x632   : > { %v1489_v35 = vmul.f32 0.7978846, %v1481_v32  ;;  %2479 = vtanh.f32 %v1488_v34 }
 0x634   : > { %2481 = vtanh.f32 %v1489_v35 }
 0x636   : > { %v2468_v36 = vpop.eup %2467 }
 0x637   : > { %v2470_v38 = vpop.eup %2469  ;;  %v1499_v40 = vadd.f32 1.0, %v2468_v36 }
 0x638   : > { %v2472_v39 = vpop.eup %2471  ;;  %v1498_v46 = vadd.f32 1.0, %v2470_v38 }
 0x639   : > { %v1500_v12 = vadd.f32 1.0, %v2472_v39  ;;  %v1507_v53 = vmul.f32 %v1499_v40, %v1443_v48 }
 0x63a   : > { %v2474_v42 = vpop.eup %2473  ;;  %v1506_v56 = vmul.f32 %v1498_v46, %v1442_v50 }
 0x63b   : > { %v1501_v26 = vadd.f32 1.0, %v2474_v42  ;;  %v1508_v23 = vmul.f32 %v1500_v12, %v1444_v44 }
 0x63d   : > { %v2476_v52 = vpop.eup %2475  ;;  %v1509_v54 = vmul.f32 %v1501_v26, %v1445_v49  ;;  %v1514_v43 = vpack.c.bf16 %v1508_v23, %v1506_v56 }
 0x63e   : > { %v2478_v55 = vpop.eup %2477  ;;  %v1503_v45 = vadd.f32 1.0, %v2476_v52 }
 0x63f   : > { %v2480_v58 = vpop.eup %2479  ;;  %v1515_v61 = vpack.c.bf16 %v1509_v54, %v1507_v53  ;;  %v1502_v30 = vadd.f32 1.0, %v2478_v55 }
 0x640   : > { %v1504_v25 = vadd.f32 1.0, %v2480_v58  ;;  %v1511_v62 = vmul.f32 %v1503_v45, %v1447_v37 }
 0x641   : > { %v2482_v14 = vpop.eup %2481  ;;  %1721 = vmatprep.mubr.bf16.mxu1 %v1515_v61  ;;  %v1510_v3 = vmul.f32 %v1502_v30, %v1446_v1 }
 0x642   : > { %1722 = vmatmul.mubr.bf16.vlgmr.msra.gmra.mxu1 %v1514_v43  ;;  %v1505_v41 = vadd.f32 1.0, %v2482_v14  ;;  %v1512_v2 = vmul.f32 %v1504_v25, %v1448_v17 }
 0x644   : > { %v1513_v0 = vmul.f32 %v1505_v41, %v1449_v33  ;;  %v1516_v5 = vpack.c.bf16 %v1512_v2, %v1510_v3 }
 0x646   : > { %v1517_v20 = vpack.c.bf16 %v1513_v0, %v1511_v62 }
 0x648   : > { %1731 = vmatprep.mubr.bf16.mxu1 %v1517_v20 }
 0x64a   : > { %1732 = vmatmul.mubr.bf16.gmra.mxu1 %v1516_v5 }
 0x702   : > { %v1723_v63 = vpop.f32.mrf.mxu1 }
 0x703   : > { %v1724_v8 = vadd.f32 %v1723_v63, %v1522_v7 }
 0x704   : > { %v1725_v59 = vpop.f32.mrf.mxu1 }
 0x705   : > { %v1742_v9 = vadd.f32 %v1724_v8, %v3068_v21  ;;  %v1726_v24 = vadd.f32 %v1725_v59, %v1526_v51 }
 0x706   : > { %v1727_v27 = vpop.f32.mrf.mxu1 }
 0x707   : > { %1750 = vst [vmem:[#allocation2 + $0x30] sm:$0xff] %v1742_v9  ;;  %v1743_v47 = vadd.f32 %v1726_v24, %v3059_v18  ;;  %v1728_v29 = vadd.f32 %v1727_v27, %v1522_v7 }
 0x708   : > { %v1729_v28 = vpop.f32.mrf.mxu1 }
 0x709   : > { %1751 = vst [vmem:[#allocation2] sm:$0xff] %v1743_v47  ;;  %v1744_v31 = vadd.f32 %v1728_v29, %v3070_v22  ;;  %v1730_v32 = vadd.f32 %v1729_v28, %v1526_v51 }
 0x70a   : > { %v1733_v4 = vpop.f32.mrf.mxu1 }
 0x70b   : > { %1752 = vst [vmem:[#allocation2 + $0x18] sm:$0xff] %v1744_v31  ;;  %v1745_v13 = vadd.f32 %v1730_v32, %v3061_v19  ;;  %v1734_v6 = vadd.f32 %v1733_v4, %v1522_v7 }
 0x70c   : > { %v1735_v34 = vpop.f32.mrf.mxu1 }
 0x70d   : > { %1753 = vst [vmem:[#allocation2 + $0x10] sm:$0xff] %v1745_v13  ;;  %v1746_v21 = vadd.f32 %v1734_v6, %v3051_v15  ;;  %v1736_v35 = vadd.f32 %v1735_v34, %v1526_v51 }
 0x70e   : > { %v1737_v36 = vpop.f32.mrf.mxu1 }
 0x70f   : > { %1754 = vst [vmem:[#allocation2 + $0x8] sm:$0xff] %v1746_v21  ;;  %v1747_v18 = vadd.f32 %v1736_v35, %v3037_v10  ;;  %v1738_v38 = vadd.f32 %v1737_v36, %v1522_v7 }
 0x710   : > { %v1739_v39 = vpop.f32.mrf.mxu1 }
 0x711   : > { %1755 = vst [vmem:[#allocation2 + $0x20] sm:$0xff] %v1747_v18  ;;  %v1748_v22 = vadd.f32 %v1738_v38, %v3053_v16  ;;  %v1740_v40 = vadd.f32 %v1739_v39, %v1526_v51 }
 0x713   : > { %1756 = vst [vmem:[#allocation2 + $0x28] sm:$0xff] %v1748_v22  ;;  %v1749_v12 = vadd.f32 %v1740_v40, %v3039_v11 }
 0x715   : > { %1757 = vst [vmem:[#allocation2 + $0x38] sm:$0xff] %v1749_v12 }
 0x716 PF: > { %s3448_s5 = sld [smem:[#allocation20_spill]] }
 0x71c   : > { %p2114_p3 = scmp.ne.s32.totalorder %s3448_s5, 2 }
 0x71e   : > { %1761 = sbr.rel (%p2114_p3) target bundleno = 1828 (0x724), region = 72 }
 0x723   : > { %1762 = vst [vmem:[%s3034_s4] sm:$0xff] %v3179_v57  ;;  %1763 = vst [vmem:[%s3034_s4 + $0x8] sm:$0xff] %v3183_v60 }
 0x724 PF: > { %s3449_s29 = sld [smem:[#allocation27_spill]]  ;;  %s2127_s8 = sshll.u32 %s2707_s11, 8 }
 0x725   : > { %s3450_s17 = sld [smem:[#allocation37_spill]]  ;;  %s1779_s21 = sshll.u32 %s3034_s4, 4  ;;  %s1780_s21 = int_to_ptr.vmem [resolvable:$true] %s1779_s21 }
 0x726   : > { %s3451_s22 = sand.u32 1, %s2671_s25   ;;  %s2567_s15 = scalar_lea.vmem %s1780_s21, 256 }
 0x727   : > { %s1765_s18 = scalar_lea.sflag [#allocation6], %s3451_s22  ;;  %p2568_p5 = scmp.ne.s32.totalorder %s1780_s21, %s2567_s15 }
 0x728   : > { %s2727_s23 = smov [#allocation10]  }
 0x729   : > { %s2571_s24 = sshll.u32 %s2727_s23, 4  ;;  %s2572_s24 = int_to_ptr.vmem [resolvable:$false] %s2571_s24 }
 0x72a   : > { %p3452_p9 = scmp.ne.s32.totalorder %s3449_s29, 0  ;;  %s2573_s30 = scalar_lea.vmem %s2572_s24, 512 }
 0x72b   : > { %s1777_s0 = scalar_lea.hbm %s3450_s17, %s2127_s8  ;;  %p2574_p1 = scmp.lt.s32.totalorder %s1780_s21, %s2572_s24 }
 0x72c   : > { %p2569_p2 = pnand %p2568_p5, %p3452_p9  ;;  %p2575_p11 = scmp.lt.s32.totalorder %s2573_s30, %s2567_s15 }
 0x72e   : > { %p2570_p7 = pneg %p2569_p2  ;;  %p2576_p6 = por %p2575_p11, %p2574_p1 }
 0x730   : > { %p2577_p0 = pnand %p2576_p6, %p2570_p7 }
 0x732   : > { %2580 = shalt.err (!%p2577_p0)
}
 0x733   : > { %s2581_s11 = scalar_lea.hbm %s1777_s0, 256  ;;  %s2585_s6 = scalar_lea.hbm %s3450_s17, 512 }
 0x734   : > { %p2582_p8 = scmp.ne.s32.totalorder %s1777_s0, %s2581_s11  ;;  %p2586_p10 = scmp.lt.s32.totalorder %s1777_s0, %s3450_s17 }
 0x735   : > { %p2587_p13 = scmp.lt.s32.totalorder %s2585_s6, %s2581_s11 }
 0x736   : > { %p2583_p12 = pnand %p2582_p8, %p3452_p9 }
 0x737   : > { %p2588_p3 = por %p2587_p13, %p2586_p10 }
 0x738   : > { %p2584_p4 = pneg %p2583_p12 }
 0x73a   : > { %p2589_p5 = pnand %p2588_p3, %p2584_p4 }
 0x73c   : > { %2592 = shalt.err (!%p2589_p5)
}
 0x73d   : > { %2134 = dma.vmem_to_hbm [thread:$0]  (%p3452_p9), %s1780_s21, 256, %s1777_s0, %s1765_s18  }
 0x73e PF: > { %s3453_s16 = sld [smem:[#allocation15_spill]]  ;;  %p2151_p2 = scmp.ge.s32.totalorder %s2719_s14, 2 }
 0x73f   : > { %s3454_s26 = sld [smem:[#allocation28_spill]] }
 0x744   : > { %s1791_s7 = sand.u32 1, %s3453_s16  }
 0x745   : > { %p3455_p7 = scmp.ne.s32.totalorder %s3454_s26, 0  ;;  %s1792_s13 = scalar_lea.sflag [#allocation6], %s1791_s7 }
 0x747   : > { %p2147_p1 = pnand %p2151_p2, %p3455_p7 }
 0x749   : > { %p2148_p11 = pneg %p2147_p1 }
 0x74b   : > { %2662 = dma.done.wait (%p2148_p11), %s1792_s13, 256  }
 0x74c   : > { %2664 = vsyncadd (%p2148_p11), %s1792_s13, 4294967040  ;;  %s26_s14 = sadd.s32 1, %s2719_s14   ;;  %s3457_s27 = sld [smem:[#allocation16_spill]] }
 0x74d   : > { %p3328_p6 = scmp.ge.s32.totalorder %s26_s14, 8   ;;  %s3458_s26 = sld [smem:[#allocation26_spill]] }
 0x74e   : > { %s3459_s4 = sld [smem:[#allocation17_spill]]  ;;  %s3468_s24 = smov %s2671_s25 }
 0x74f   : > { %s3460_s29 = sld [smem:[#allocation29_spill]] }
 0x750   : > { %s3461_s30 = sld [smem:[#allocation18_spill]] }
 0x751   : > { %s3462_s8 = sld [smem:[#allocation19_spill]] }
 0x752   : > { %s3463_s9 = sld [smem:[#allocation25_spill]]  ;;  %s3469_s25 = smov %s3457_s27 }
 0x753   : > { %s3464_s10 = sld [smem:[#allocation21_spill]]  ;;  %s3470_s27 = smov %s2683_s28 }
 0x754   : > { %s3465_s11 = sld [smem:[#allocation22_spill]]  ;;  %s3471_s28 = smov %s3459_s4 }
 0x755   : > { %s3466_s12 = sld [smem:[#allocation23_spill]]  ;;  %25 = sbr.rel (!%p3328_p6) target bundleno = 21 (0x15), region = 144 }
 0x756   : > { %s3467_s13 = sld [smem:[#allocation24_spill]] }
 0x75a   :  { %1797 = vsyncpa [#allocation5], 1 }
 0x75b   :  { %1799 = vsyncpa [#allocation5 + $0x1], 1 }
 0x75c   :  { %1800 = vsyncpa [#allocation8], 1 }
 0x75d   :  { %1802 = vsyncpa [#allocation8 + $0x1], 1 }
 0x75e   :  { %1803 = vsyncpa [#allocation6], 1 }
 0x75f   :  { %1805 = vsyncpa [#allocation6 + $0x1], 1 }

</bundles_post_ra>
